<compile_context>
chip_gen: v7x
topology: tpu7x:2x2x1
jax: 0.10.0
libtpu: 0.0.40
codegen_flags: <defaults>
</compile_context>

<pallas_src>
import jax
import jax.numpy as jnp
from jax import lax
from jax.experimental import pallas as pl
from jax.experimental.pallas import tpu as pltpu


def _lstm_last_kernel(x_ref, wih_ref, whh_ref, b_ref, out_ref, h_ref, c_ref):
    """One grid step = one tile of tile_T timesteps.

    x_ref   : (B, tile_T, I)  native batch-first input tile
    wih_ref : (I,  4*Hp)      W_ih^T, gate k in lanes [k*Hp, k*Hp+H), zero pad
    whh_ref : (Hp, 4*Hp)      W_hh^T, same lane-aligned gate layout
    b_ref   : (1,  4*Hp)      b_ih + b_hh (zero in padded lanes)
    out_ref : (B,  Hp)        h_T (padded lanes stay exactly zero)
    h_ref, c_ref : (B, Hp) VMEM scratch carried across the T grid axis
    """
    t = pl.program_id(0)

    @pl.when(t == 0)
    def _init():
        h_ref[...] = jnp.zeros_like(h_ref)
        c_ref[...] = jnp.zeros_like(c_ref)

    B, tile_t, _ = x_ref.shape
    Hp = h_ref.shape[1]

    wih = wih_ref[...]          # (I, 4Hp)   VMEM resident
    whh = whh_ref[...]          # (Hp, 4Hp)  VMEM resident
    bias = b_ref[...]           # (1, 4Hp)

    # --- Input projection hoisted out of the recurrence ----------------------
    # All timestep projections of this tile are independent of h/c, so the
    # scheduler can run them (MXU) concurrently with the serial EUP/VPU chain.
    xg = [
        jnp.dot(x_ref[:, tt, :], wih, preferred_element_type=jnp.float32) + bias
        for tt in range(tile_t)
    ]  # tile_t x (B, 4Hp)

    h = h_ref[...]
    c = c_ref[...]

    # --- Serial recurrence over the tile (tile_T small & static) -------------
    for tt in range(tile_t):
        gates = xg[tt] + jnp.dot(h, whh, preferred_element_type=jnp.float32)

        # 3 EUP pushes per step on full lane-aligned slabs (no exact divide).
        sig = 0.5 * (jnp.tanh(gates * 0.5) + 1.0)   # i | f | . | o
        tnh = jnp.tanh(gates)                       # . | . | g | .

        i_g = sig[:, 0 * Hp:1 * Hp]
        f_g = sig[:, 1 * Hp:2 * Hp]
        g_g = tnh[:, 2 * Hp:3 * Hp]
        o_g = sig[:, 3 * Hp:4 * Hp]

        c = f_g * c + i_g * g_g        # padded lanes: 0.5*0 + 0.5*0 = 0
        h = o_g * jnp.tanh(c)          # padded lanes stay 0

    h_ref[...] = h
    c_ref[...] = c

    @pl.when(t == pl.num_programs(0) - 1)
    def _finalize():
        out_ref[...] = h.astype(out_ref.dtype)


def macro_state_lstm(x, w_ih, w_hh, b_ih, b_hh, *, tile_t=None):
    """x: (B, T, I) float32. Weights follow torch.nn.LSTM conventions:
       w_ih (4H, I), w_hh (4H, H), b_ih (4H,), b_hh (4H,).
       Returns (B, H) = last-timestep hidden state."""
    B, T, I = x.shape
    H = w_hh.shape[1]
    assert w_ih.shape == (4 * H, I)

    # Per-gate lane-aligned slab width (multiple of 128 lanes).
    Hp = 128 * ((H + 127) // 128)

    # Tile over T: tile_T must be a multiple of 8 (sublane) or equal T.
    if tile_t is None:
        tile_t = 8 if (T % 8 == 0) else T
    if T % tile_t != 0 or (tile_t != T and tile_t % 8 != 0):
        tile_t = T
    grid_t = T // tile_t

    # Re-layout parameters: gate k of W^T lives in lanes [k*Hp, k*Hp + H).
    f32 = jnp.float32
    b_sum = (b_ih + b_hh).astype(f32)
    wih_t = jnp.zeros((I, 4 * Hp), f32)
    whh_t = jnp.zeros((Hp, 4 * Hp), f32)
    bias = jnp.zeros((1, 4 * Hp), f32)
    for g in range(4):
        wih_t = wih_t.at[:, g * Hp:g * Hp + H].set(
            w_ih[g * H:(g + 1) * H, :].T.astype(f32))
        whh_t = whh_t.at[:H, g * Hp:g * Hp + H].set(
            w_hh[g * H:(g + 1) * H, :].T.astype(f32))
        bias = bias.at[:, g * Hp:g * Hp + H].set(b_sum[g * H:(g + 1) * H][None, :])

    out_padded = pl.pallas_call(
        _lstm_last_kernel,
        out_shape=jax.ShapeDtypeStruct((B, Hp), jnp.float32),
        grid_spec=pltpu.PrefetchScalarGridSpec(
            num_scalar_prefetch=0,
            grid=(grid_t,),
            in_specs=[
                pl.BlockSpec((B, tile_t, I), lambda t: (0, t, 0)),   # x tile
                pl.BlockSpec((I, 4 * Hp), lambda t: (0, 0)),          # W_ih^T
                pl.BlockSpec((Hp, 4 * Hp), lambda t: (0, 0)),         # W_hh^T
                pl.BlockSpec((1, 4 * Hp), lambda t: (0, 0)),          # bias
            ],
            out_specs=pl.BlockSpec((B, Hp), lambda t: (0, 0)),
            scratch_shapes=[
                pltpu.VMEM((B, Hp), jnp.float32),   # h carry
                pltpu.VMEM((B, Hp), jnp.float32),   # c carry
            ],
        ),
        compiler_params=pltpu.CompilerParams(
            dimension_semantics=("arbitrary",),     # recurrence over T tiles
        ),
    )(x.astype(jnp.float32), wih_t, whh_t, bias)

    return out_padded[:, :H]


def _reference_lstm_last(x, w_ih, w_hh, b_ih, b_hh):
    """Pure-JAX reference matching torch.nn.LSTM forward (batch_first)."""
    B, T, I = x.shape
    H = w_hh.shape[1]
    bias = b_ih + b_hh

    def step(carry, x_t):
        h, c = carry
        gates = x_t @ w_ih.T + h @ w_hh.T + bias
        i = jax.nn.sigmoid(gates[:, 0 * H:1 * H])
        f = jax.nn.sigmoid(gates[:, 1 * H:2 * H])
        g = jnp.tanh(gates[:, 2 * H:3 * H])
        o = jax.nn.sigmoid(gates[:, 3 * H:4 * H])
        c_new = f * c + i * g
        h_new = o * jnp.tanh(c_new)
        return (h_new, c_new), h_new

    h0 = jnp.zeros((B, H), jnp.float32)
    c0 = jnp.zeros((B, H), jnp.float32)
    (_, _), hs = lax.scan(step, (h0, c0), jnp.transpose(x, (1, 0, 2)))
    return hs[-1]


if __name__ == "__main__":
    # Small shapes consistent with the module's forward: (batch, seq, input_size).
    # T=16 with tile_t=8 exercises the multi-step grid carry of h/c.
    B, T, I, H = 2, 16, 16, 32

    key = jax.random.PRNGKey(0)
    kx, k1, k2, k3, k4 = jax.random.split(key, 5)

    x = jax.random.normal(kx, (B, T, I), dtype=jnp.float32)

    # PyTorch-style uniform(-1/sqrt(H), 1/sqrt(H)) init.
    bound = 1.0 / jnp.sqrt(jnp.float32(H))
    w_ih = jax.random.uniform(k1, (4 * H, I), jnp.float32, -bound, bound)
    w_hh = jax.random.uniform(k2, (4 * H, H), jnp.float32, -bound, bound)
    b_ih = jax.random.uniform(k3, (4 * H,), jnp.float32, -bound, bound)
    b_hh = jax.random.uniform(k4, (4 * H,), jnp.float32, -bound, bound)

    out = macro_state_lstm(x, w_ih, w_hh, b_ih, b_hh)
    out = jax.block_until_ready(out)

    ref = _reference_lstm_last(x, w_ih, w_hh, b_ih, b_hh)
    assert out.shape == (B, H)
    assert jnp.allclose(out, ref, atol=1e-3, rtol=1e-3), "Pallas LSTM mismatch vs reference"

    print("KERNEL_OK")
</pallas_src>

<mosaic_0001>
module attributes {stable_mosaic.version = 11 : i64} {
  func.func @_lstm_last_kernel(%arg0: i32, %arg1: memref<2x8x16xf32, #tpu.memory_space<vmem>>, %arg2: memref<16x512xf32, #tpu.memory_space<vmem>>, %arg3: memref<128x512xf32, #tpu.memory_space<vmem>>, %arg4: memref<1x512xf32, #tpu.memory_space<vmem>>, %arg5: memref<2x128xf32, #tpu.memory_space<vmem>>, %arg6: memref<2x128xf32, #tpu.memory_space<vmem>>, %arg7: memref<2x128xf32, #tpu.memory_space<vmem>>) attributes {dimension_semantics = [#tpu.dimension_semantics<arbitrary>], iteration_bounds = array<i64: 2>, scalar_prefetch = 0 : i64, scratch_operands = 2 : i64, tpu.core_type = #tpu.core_type<tc>, window_params = [{transform_indices = @transform_0, window_bounds = array<i64: 2, 8, 16>}, {pipeline_mode = #tpu.pipeline_mode<synchronous>, transform_indices = @transform_1, window_bounds = array<i64: 16, 512>}, {pipeline_mode = #tpu.pipeline_mode<synchronous>, transform_indices = @transform_2, window_bounds = array<i64: 128, 512>}, {pipeline_mode = #tpu.pipeline_mode<synchronous>, transform_indices = @transform_3, window_bounds = array<i64: 1, 512>}, {pipeline_mode = #tpu.pipeline_mode<synchronous>, transform_indices = @transform_4, window_bounds = array<i64: 2, 128>}]} {
    %c0_i32 = arith.constant 0 : i32
    %0 = arith.cmpi eq, %arg0, %c0_i32 : i32
    %1 = arith.extui %0 : i1 to i32
    %c0_i32_0 = arith.constant 0 : i32
    %2 = arith.cmpi ne, %1, %c0_i32_0 : i32
    scf.if %2 {
      %cst_71 = arith.constant 0.000000e+00 : f32
      %205 = vector.broadcast %cst_71 : f32 to vector<2x128xf32>
      %c0_72 = arith.constant 0 : index
      %c0_73 = arith.constant 0 : index
      %206 = vector.load %arg6[%c0_72, %c0_73] : memref<2x128xf32, #tpu.memory_space<vmem>>, vector<2x128xf32>
      tpu.vector_store %arg6[%c0_72, %c0_73], %205 {strides = array<i32>} : memref<2x128xf32, #tpu.memory_space<vmem>>, vector<2x128xf32>,
      %cst_74 = arith.constant 0.000000e+00 : f32
      %207 = vector.broadcast %cst_74 : f32 to vector<2x128xf32>
      %c0_75 = arith.constant 0 : index
      %c0_76 = arith.constant 0 : index
      %208 = vector.load %arg7[%c0_75, %c0_76] : memref<2x128xf32, #tpu.memory_space<vmem>>, vector<2x128xf32>
      tpu.vector_store %arg7[%c0_75, %c0_76], %207 {strides = array<i32>} : memref<2x128xf32, #tpu.memory_space<vmem>>, vector<2x128xf32>,
    } else {
    }
    %c0 = arith.constant 0 : index
    %c0_1 = arith.constant 0 : index
    %3 = vector.load %arg2[%c0, %c0_1] : memref<16x512xf32, #tpu.memory_space<vmem>>, vector<16x512xf32>
    %c0_2 = arith.constant 0 : index
    %c0_3 = arith.constant 0 : index
    %4 = vector.load %arg3[%c0_2, %c0_3] : memref<128x512xf32, #tpu.memory_space<vmem>>, vector<128x512xf32>
    %c0_4 = arith.constant 0 : index
    %c0_5 = arith.constant 0 : index
    %5 = vector.load %arg4[%c0_4, %c0_5] : memref<1x512xf32, #tpu.memory_space<vmem>>, vector<1x512xf32>
    %c0_6 = arith.constant 0 : index
    %c0_7 = arith.constant 0 : index
    %c0_8 = arith.constant 0 : index
    %6 = vector.load %arg1[%c0_6, %c0_7, %c0_8] : memref<2x8x16xf32, #tpu.memory_space<vmem>>, vector<2x1x16xf32>
    %7 = vector.shape_cast %6 : vector<2x1x16xf32> to vector<2x16xf32>
    %cst = arith.constant dense<0.000000e+00> : vector<2x512xf32>
    %8 = tpu.matmul %7, %3, %cst {dimension_numbers = #tpu.dot_dimension_numbers<[1], [0], [0], [1], [0, 0, 1, 1], [], []>} : vector<2x16xf32>, vector<16x512xf32>, vector<2x512xf32> -> vector<2x512xf32>
    %9 = vector.broadcast %5 : vector<1x512xf32> to vector<2x512xf32>
    %10 = arith.addf %8, %9 : vector<2x512xf32>
    %c0_9 = arith.constant 0 : index
    %c1 = arith.constant 1 : index
    %c0_10 = arith.constant 0 : index
    %11 = vector.load %arg1[%c0_9, %c1, %c0_10] : memref<2x8x16xf32, #tpu.memory_space<vmem>>, vector<2x1x16xf32>
    %12 = vector.shape_cast %11 : vector<2x1x16xf32> to vector<2x16xf32>
    %cst_11 = arith.constant dense<0.000000e+00> : vector<2x512xf32>
    %13 = tpu.matmul %12, %3, %cst_11 {dimension_numbers = #tpu.dot_dimension_numbers<[1], [0], [0], [1], [0, 0, 1, 1], [], []>} : vector<2x16xf32>, vector<16x512xf32>, vector<2x512xf32> -> vector<2x512xf32>
    %14 = vector.broadcast %5 : vector<1x512xf32> to vector<2x512xf32>
    %15 = arith.addf %13, %14 : vector<2x512xf32>
    %c0_12 = arith.constant 0 : index
    %c2 = arith.constant 2 : index
    %c0_13 = arith.constant 0 : index
    %16 = vector.load %arg1[%c0_12, %c2, %c0_13] : memref<2x8x16xf32, #tpu.memory_space<vmem>>, vector<2x1x16xf32>
    %17 = vector.shape_cast %16 : vector<2x1x16xf32> to vector<2x16xf32>
    %cst_14 = arith.constant dense<0.000000e+00> : vector<2x512xf32>
    %18 = tpu.matmul %17, %3, %cst_14 {dimension_numbers = #tpu.dot_dimension_numbers<[1], [0], [0], [1], [0, 0, 1, 1], [], []>} : vector<2x16xf32>, vector<16x512xf32>, vector<2x512xf32> -> vector<2x512xf32>
    %19 = vector.broadcast %5 : vector<1x512xf32> to vector<2x512xf32>
    %20 = arith.addf %18, %19 : vector<2x512xf32>
    %c0_15 = arith.constant 0 : index
    %c3 = arith.constant 3 : index
    %c0_16 = arith.constant 0 : index
    %21 = vector.load %arg1[%c0_15, %c3, %c0_16] : memref<2x8x16xf32, #tpu.memory_space<vmem>>, vector<2x1x16xf32>
    %22 = vector.shape_cast %21 : vector<2x1x16xf32> to vector<2x16xf32>
    %cst_17 = arith.constant dense<0.000000e+00> : vector<2x512xf32>
    %23 = tpu.matmul %22, %3, %cst_17 {dimension_numbers = #tpu.dot_dimension_numbers<[1], [0], [0], [1], [0, 0, 1, 1], [], []>} : vector<2x16xf32>, vector<16x512xf32>, vector<2x512xf32> -> vector<2x512xf32>
    %24 = vector.broadcast %5 : vector<1x512xf32> to vector<2x512xf32>
    %25 = arith.addf %23, %24 : vector<2x512xf32>
    %c0_18 = arith.constant 0 : index
    %c4 = arith.constant 4 : index
    %c0_19 = arith.constant 0 : index
    %26 = vector.load %arg1[%c0_18, %c4, %c0_19] : memref<2x8x16xf32, #tpu.memory_space<vmem>>, vector<2x1x16xf32>
    %27 = vector.shape_cast %26 : vector<2x1x16xf32> to vector<2x16xf32>
    %cst_20 = arith.constant dense<0.000000e+00> : vector<2x512xf32>
    %28 = tpu.matmul %27, %3, %cst_20 {dimension_numbers = #tpu.dot_dimension_numbers<[1], [0], [0], [1], [0, 0, 1, 1], [], []>} : vector<2x16xf32>, vector<16x512xf32>, vector<2x512xf32> -> vector<2x512xf32>
    %29 = vector.broadcast %5 : vector<1x512xf32> to vector<2x512xf32>
    %30 = arith.addf %28, %29 : vector<2x512xf32>
    %c0_21 = arith.constant 0 : index
    %c5 = arith.constant 5 : index
    %c0_22 = arith.constant 0 : index
    %31 = vector.load %arg1[%c0_21, %c5, %c0_22] : memref<2x8x16xf32, #tpu.memory_space<vmem>>, vector<2x1x16xf32>
    %32 = vector.shape_cast %31 : vector<2x1x16xf32> to vector<2x16xf32>
    %cst_23 = arith.constant dense<0.000000e+00> : vector<2x512xf32>
    %33 = tpu.matmul %32, %3, %cst_23 {dimension_numbers = #tpu.dot_dimension_numbers<[1], [0], [0], [1], [0, 0, 1, 1], [], []>} : vector<2x16xf32>, vector<16x512xf32>, vector<2x512xf32> -> vector<2x512xf32>
    %34 = vector.broadcast %5 : vector<1x512xf32> to vector<2x512xf32>
    %35 = arith.addf %33, %34 : vector<2x512xf32>
    %c0_24 = arith.constant 0 : index
    %c6 = arith.constant 6 : index
    %c0_25 = arith.constant 0 : index
    %36 = vector.load %arg1[%c0_24, %c6, %c0_25] : memref<2x8x16xf32, #tpu.memory_space<vmem>>, vector<2x1x16xf32>
    %37 = vector.shape_cast %36 : vector<2x1x16xf32> to vector<2x16xf32>
    %cst_26 = arith.constant dense<0.000000e+00> : vector<2x512xf32>
    %38 = tpu.matmul %37, %3, %cst_26 {dimension_numbers = #tpu.dot_dimension_numbers<[1], [0], [0], [1], [0, 0, 1, 1], [], []>} : vector<2x16xf32>, vector<16x512xf32>, vector<2x512xf32> -> vector<2x512xf32>
    %39 = vector.broadcast %5 : vector<1x512xf32> to vector<2x512xf32>
    %40 = arith.addf %38, %39 : vector<2x512xf32>
    %c0_27 = arith.constant 0 : index
    %c7 = arith.constant 7 : index
    %c0_28 = arith.constant 0 : index
    %41 = vector.load %arg1[%c0_27, %c7, %c0_28] : memref<2x8x16xf32, #tpu.memory_space<vmem>>, vector<2x1x16xf32>
    %42 = vector.shape_cast %41 : vector<2x1x16xf32> to vector<2x16xf32>
    %cst_29 = arith.constant dense<0.000000e+00> : vector<2x512xf32>
    %43 = tpu.matmul %42, %3, %cst_29 {dimension_numbers = #tpu.dot_dimension_numbers<[1], [0], [0], [1], [0, 0, 1, 1], [], []>} : vector<2x16xf32>, vector<16x512xf32>, vector<2x512xf32> -> vector<2x512xf32>
    %44 = vector.broadcast %5 : vector<1x512xf32> to vector<2x512xf32>
    %45 = arith.addf %43, %44 : vector<2x512xf32>
    %c0_30 = arith.constant 0 : index
    %c0_31 = arith.constant 0 : index
    %46 = vector.load %arg6[%c0_30, %c0_31] : memref<2x128xf32, #tpu.memory_space<vmem>>, vector<2x128xf32>
    %c0_32 = arith.constant 0 : index
    %c0_33 = arith.constant 0 : index
    %47 = vector.load %arg7[%c0_32, %c0_33] : memref<2x128xf32, #tpu.memory_space<vmem>>, vector<2x128xf32>
    %cst_34 = arith.constant dense<0.000000e+00> : vector<2x512xf32>
    %48 = tpu.matmul %46, %4, %cst_34 {dimension_numbers = #tpu.dot_dimension_numbers<[1], [0], [0], [1], [0, 0, 1, 1], [], []>} : vector<2x128xf32>, vector<128x512xf32>, vector<2x512xf32> -> vector<2x512xf32>
    %49 = arith.addf %10, %48 : vector<2x512xf32>
    %cst_35 = arith.constant 5.000000e-01 : f32
    %50 = vector.broadcast %cst_35 : f32 to vector<2x512xf32>
    %51 = arith.mulf %49, %50 : vector<2x512xf32>
    %52 = math.tanh %51 : vector<2x512xf32>
    %cst_36 = arith.constant 1.000000e+00 : f32
    %53 = vector.broadcast %cst_36 : f32 to vector<2x512xf32>
    %54 = arith.addf %52, %53 : vector<2x512xf32>
    %cst_37 = arith.constant 5.000000e-01 : f32
    %55 = vector.broadcast %cst_37 : f32 to vector<2x512xf32>
    %56 = arith.mulf %55, %54 : vector<2x512xf32>
    %57 = math.tanh %49 : vector<2x512xf32>
    %58 = vector.extract_strided_slice %56 {offsets = [0, 0], sizes = [2, 128], strides = [1, 1]} : vector<2x512xf32> to vector<2x128xf32>
    %59 = vector.extract_strided_slice %56 {offsets = [0, 128], sizes = [2, 128], strides = [1, 1]} : vector<2x512xf32> to vector<2x128xf32>
    %60 = vector.extract_strided_slice %57 {offsets = [0, 256], sizes = [2, 128], strides = [1, 1]} : vector<2x512xf32> to vector<2x128xf32>
    %61 = vector.extract_strided_slice %56 {offsets = [0, 384], sizes = [2, 128], strides = [1, 1]} : vector<2x512xf32> to vector<2x128xf32>
    %62 = arith.mulf %59, %47 : vector<2x128xf32>
    %63 = arith.mulf %58, %60 : vector<2x128xf32>
    %64 = arith.addf %62, %63 : vector<2x128xf32>
    %65 = math.tanh %64 : vector<2x128xf32>
    %66 = arith.mulf %61, %65 : vector<2x128xf32>
    %cst_38 = arith.constant dense<0.000000e+00> : vector<2x512xf32>
    %67 = tpu.matmul %66, %4, %cst_38 {dimension_numbers = #tpu.dot_dimension_numbers<[1], [0], [0], [1], [0, 0, 1, 1], [], []>} : vector<2x128xf32>, vector<128x512xf32>, vector<2x512xf32> -> vector<2x512xf32>
    %68 = arith.addf %15, %67 : vector<2x512xf32>
    %cst_39 = arith.constant 5.000000e-01 : f32
    %69 = vector.broadcast %cst_39 : f32 to vector<2x512xf32>
    %70 = arith.mulf %68, %69 : vector<2x512xf32>
    %71 = math.tanh %70 : vector<2x512xf32>
    %cst_40 = arith.constant 1.000000e+00 : f32
    %72 = vector.broadcast %cst_40 : f32 to vector<2x512xf32>
    %73 = arith.addf %71, %72 : vector<2x512xf32>
    %cst_41 = arith.constant 5.000000e-01 : f32
    %74 = vector.broadcast %cst_41 : f32 to vector<2x512xf32>
    %75 = arith.mulf %74, %73 : vector<2x512xf32>
    %76 = math.tanh %68 : vector<2x512xf32>
    %77 = vector.extract_strided_slice %75 {offsets = [0, 0], sizes = [2, 128], strides = [1, 1]} : vector<2x512xf32> to vector<2x128xf32>
    %78 = vector.extract_strided_slice %75 {offsets = [0, 128], sizes = [2, 128], strides = [1, 1]} : vector<2x512xf32> to vector<2x128xf32>
    %79 = vector.extract_strided_slice %76 {offsets = [0, 256], sizes = [2, 128], strides = [1, 1]} : vector<2x512xf32> to vector<2x128xf32>
    %80 = vector.extract_strided_slice %75 {offsets = [0, 384], sizes = [2, 128], strides = [1, 1]} : vector<2x512xf32> to vector<2x128xf32>
    %81 = arith.mulf %78, %64 : vector<2x128xf32>
    %82 = arith.mulf %77, %79 : vector<2x128xf32>
    %83 = arith.addf %81, %82 : vector<2x128xf32>
    %84 = math.tanh %83 : vector<2x128xf32>
    %85 = arith.mulf %80, %84 : vector<2x128xf32>
    %cst_42 = arith.constant dense<0.000000e+00> : vector<2x512xf32>
    %86 = tpu.matmul %85, %4, %cst_42 {dimension_numbers = #tpu.dot_dimension_numbers<[1], [0], [0], [1], [0, 0, 1, 1], [], []>} : vector<2x128xf32>, vector<128x512xf32>, vector<2x512xf32> -> vector<2x512xf32>
    %87 = arith.addf %20, %86 : vector<2x512xf32>
    %cst_43 = arith.constant 5.000000e-01 : f32
    %88 = vector.broadcast %cst_43 : f32 to vector<2x512xf32>
    %89 = arith.mulf %87, %88 : vector<2x512xf32>
    %90 = math.tanh %89 : vector<2x512xf32>
    %cst_44 = arith.constant 1.000000e+00 : f32
    %91 = vector.broadcast %cst_44 : f32 to vector<2x512xf32>
    %92 = arith.addf %90, %91 : vector<2x512xf32>
    %cst_45 = arith.constant 5.000000e-01 : f32
    %93 = vector.broadcast %cst_45 : f32 to vector<2x512xf32>
    %94 = arith.mulf %93, %92 : vector<2x512xf32>
    %95 = math.tanh %87 : vector<2x512xf32>
    %96 = vector.extract_strided_slice %94 {offsets = [0, 0], sizes = [2, 128], strides = [1, 1]} : vector<2x512xf32> to vector<2x128xf32>
    %97 = vector.extract_strided_slice %94 {offsets = [0, 128], sizes = [2, 128], strides = [1, 1]} : vector<2x512xf32> to vector<2x128xf32>
    %98 = vector.extract_strided_slice %95 {offsets = [0, 256], sizes = [2, 128], strides = [1, 1]} : vector<2x512xf32> to vector<2x128xf32>
    %99 = vector.extract_strided_slice %94 {offsets = [0, 384], sizes = [2, 128], strides = [1, 1]} : vector<2x512xf32> to vector<2x128xf32>
    %100 = arith.mulf %97, %83 : vector<2x128xf32>
    %101 = arith.mulf %96, %98 : vector<2x128xf32>
    %102 = arith.addf %100, %101 : vector<2x128xf32>
    %103 = math.tanh %102 : vector<2x128xf32>
    %104 = arith.mulf %99, %103 : vector<2x128xf32>
    %cst_46 = arith.constant dense<0.000000e+00> : vector<2x512xf32>
    %105 = tpu.matmul %104, %4, %cst_46 {dimension_numbers = #tpu.dot_dimension_numbers<[1], [0], [0], [1], [0, 0, 1, 1], [], []>} : vector<2x128xf32>, vector<128x512xf32>, vector<2x512xf32> -> vector<2x512xf32>
    %106 = arith.addf %25, %105 : vector<2x512xf32>
    %cst_47 = arith.constant 5.000000e-01 : f32
    %107 = vector.broadcast %cst_47 : f32 to vector<2x512xf32>
    %108 = arith.mulf %106, %107 : vector<2x512xf32>
    %109 = math.tanh %108 : vector<2x512xf32>
    %cst_48 = arith.constant 1.000000e+00 : f32
    %110 = vector.broadcast %cst_48 : f32 to vector<2x512xf32>
    %111 = arith.addf %109, %110 : vector<2x512xf32>
    %cst_49 = arith.constant 5.000000e-01 : f32
    %112 = vector.broadcast %cst_49 : f32 to vector<2x512xf32>
    %113 = arith.mulf %112, %111 : vector<2x512xf32>
    %114 = math.tanh %106 : vector<2x512xf32>
    %115 = vector.extract_strided_slice %113 {offsets = [0, 0], sizes = [2, 128], strides = [1, 1]} : vector<2x512xf32> to vector<2x128xf32>
    %116 = vector.extract_strided_slice %113 {offsets = [0, 128], sizes = [2, 128], strides = [1, 1]} : vector<2x512xf32> to vector<2x128xf32>
    %117 = vector.extract_strided_slice %114 {offsets = [0, 256], sizes = [2, 128], strides = [1, 1]} : vector<2x512xf32> to vector<2x128xf32>
    %118 = vector.extract_strided_slice %113 {offsets = [0, 384], sizes = [2, 128], strides = [1, 1]} : vector<2x512xf32> to vector<2x128xf32>
    %119 = arith.mulf %116, %102 : vector<2x128xf32>
    %120 = arith.mulf %115, %117 : vector<2x128xf32>
    %121 = arith.addf %119, %120 : vector<2x128xf32>
    %122 = math.tanh %121 : vector<2x128xf32>
    %123 = arith.mulf %118, %122 : vector<2x128xf32>
    %cst_50 = arith.constant dense<0.000000e+00> : vector<2x512xf32>
    %124 = tpu.matmul %123, %4, %cst_50 {dimension_numbers = #tpu.dot_dimension_numbers<[1], [0], [0], [1], [0, 0, 1, 1], [], []>} : vector<2x128xf32>, vector<128x512xf32>, vector<2x512xf32> -> vector<2x512xf32>
    %125 = arith.addf %30, %124 : vector<2x512xf32>
    %cst_51 = arith.constant 5.000000e-01 : f32
    %126 = vector.broadcast %cst_51 : f32 to vector<2x512xf32>
    %127 = arith.mulf %125, %126 : vector<2x512xf32>
    %128 = math.tanh %127 : vector<2x512xf32>
    %cst_52 = arith.constant 1.000000e+00 : f32
    %129 = vector.broadcast %cst_52 : f32 to vector<2x512xf32>
    %130 = arith.addf %128, %129 : vector<2x512xf32>
    %cst_53 = arith.constant 5.000000e-01 : f32
    %131 = vector.broadcast %cst_53 : f32 to vector<2x512xf32>
    %132 = arith.mulf %131, %130 : vector<2x512xf32>
    %133 = math.tanh %125 : vector<2x512xf32>
    %134 = vector.extract_strided_slice %132 {offsets = [0, 0], sizes = [2, 128], strides = [1, 1]} : vector<2x512xf32> to vector<2x128xf32>
    %135 = vector.extract_strided_slice %132 {offsets = [0, 128], sizes = [2, 128], strides = [1, 1]} : vector<2x512xf32> to vector<2x128xf32>
    %136 = vector.extract_strided_slice %133 {offsets = [0, 256], sizes = [2, 128], strides = [1, 1]} : vector<2x512xf32> to vector<2x128xf32>
    %137 = vector.extract_strided_slice %132 {offsets = [0, 384], sizes = [2, 128], strides = [1, 1]} : vector<2x512xf32> to vector<2x128xf32>
    %138 = arith.mulf %135, %121 : vector<2x128xf32>
    %139 = arith.mulf %134, %136 : vector<2x128xf32>
    %140 = arith.addf %138, %139 : vector<2x128xf32>
    %141 = math.tanh %140 : vector<2x128xf32>
    %142 = arith.mulf %137, %141 : vector<2x128xf32>
    %cst_54 = arith.constant dense<0.000000e+00> : vector<2x512xf32>
    %143 = tpu.matmul %142, %4, %cst_54 {dimension_numbers = #tpu.dot_dimension_numbers<[1], [0], [0], [1], [0, 0, 1, 1], [], []>} : vector<2x128xf32>, vector<128x512xf32>, vector<2x512xf32> -> vector<2x512xf32>
    %144 = arith.addf %35, %143 : vector<2x512xf32>
    %cst_55 = arith.constant 5.000000e-01 : f32
    %145 = vector.broadcast %cst_55 : f32 to vector<2x512xf32>
    %146 = arith.mulf %144, %145 : vector<2x512xf32>
    %147 = math.tanh %146 : vector<2x512xf32>
    %cst_56 = arith.constant 1.000000e+00 : f32
    %148 = vector.broadcast %cst_56 : f32 to vector<2x512xf32>
    %149 = arith.addf %147, %148 : vector<2x512xf32>
    %cst_57 = arith.constant 5.000000e-01 : f32
    %150 = vector.broadcast %cst_57 : f32 to vector<2x512xf32>
    %151 = arith.mulf %150, %149 : vector<2x512xf32>
    %152 = math.tanh %144 : vector<2x512xf32>
    %153 = vector.extract_strided_slice %151 {offsets = [0, 0], sizes = [2, 128], strides = [1, 1]} : vector<2x512xf32> to vector<2x128xf32>
    %154 = vector.extract_strided_slice %151 {offsets = [0, 128], sizes = [2, 128], strides = [1, 1]} : vector<2x512xf32> to vector<2x128xf32>
    %155 = vector.extract_strided_slice %152 {offsets = [0, 256], sizes = [2, 128], strides = [1, 1]} : vector<2x512xf32> to vector<2x128xf32>
    %156 = vector.extract_strided_slice %151 {offsets = [0, 384], sizes = [2, 128], strides = [1, 1]} : vector<2x512xf32> to vector<2x128xf32>
    %157 = arith.mulf %154, %140 : vector<2x128xf32>
    %158 = arith.mulf %153, %155 : vector<2x128xf32>
    %159 = arith.addf %157, %158 : vector<2x128xf32>
    %160 = math.tanh %159 : vector<2x128xf32>
    %161 = arith.mulf %156, %160 : vector<2x128xf32>
    %cst_58 = arith.constant dense<0.000000e+00> : vector<2x512xf32>
    %162 = tpu.matmul %161, %4, %cst_58 {dimension_numbers = #tpu.dot_dimension_numbers<[1], [0], [0], [1], [0, 0, 1, 1], [], []>} : vector<2x128xf32>, vector<128x512xf32>, vector<2x512xf32> -> vector<2x512xf32>
    %163 = arith.addf %40, %162 : vector<2x512xf32>
    %cst_59 = arith.constant 5.000000e-01 : f32
    %164 = vector.broadcast %cst_59 : f32 to vector<2x512xf32>
    %165 = arith.mulf %163, %164 : vector<2x512xf32>
    %166 = math.tanh %165 : vector<2x512xf32>
    %cst_60 = arith.constant 1.000000e+00 : f32
    %167 = vector.broadcast %cst_60 : f32 to vector<2x512xf32>
    %168 = arith.addf %166, %167 : vector<2x512xf32>
    %cst_61 = arith.constant 5.000000e-01 : f32
    %169 = vector.broadcast %cst_61 : f32 to vector<2x512xf32>
    %170 = arith.mulf %169, %168 : vector<2x512xf32>
    %171 = math.tanh %163 : vector<2x512xf32>
    %172 = vector.extract_strided_slice %170 {offsets = [0, 0], sizes = [2, 128], strides = [1, 1]} : vector<2x512xf32> to vector<2x128xf32>
    %173 = vector.extract_strided_slice %170 {offsets = [0, 128], sizes = [2, 128], strides = [1, 1]} : vector<2x512xf32> to vector<2x128xf32>
    %174 = vector.extract_strided_slice %171 {offsets = [0, 256], sizes = [2, 128], strides = [1, 1]} : vector<2x512xf32> to vector<2x128xf32>
    %175 = vector.extract_strided_slice %170 {offsets = [0, 384], sizes = [2, 128], strides = [1, 1]} : vector<2x512xf32> to vector<2x128xf32>
    %176 = arith.mulf %173, %159 : vector<2x128xf32>
    %177 = arith.mulf %172, %174 : vector<2x128xf32>
    %178 = arith.addf %176, %177 : vector<2x128xf32>
    %179 = math.tanh %178 : vector<2x128xf32>
    %180 = arith.mulf %175, %179 : vector<2x128xf32>
    %cst_62 = arith.constant dense<0.000000e+00> : vector<2x512xf32>
    %181 = tpu.matmul %180, %4, %cst_62 {dimension_numbers = #tpu.dot_dimension_numbers<[1], [0], [0], [1], [0, 0, 1, 1], [], []>} : vector<2x128xf32>, vector<128x512xf32>, vector<2x512xf32> -> vector<2x512xf32>
    %182 = arith.addf %45, %181 : vector<2x512xf32>
    %cst_63 = arith.constant 5.000000e-01 : f32
    %183 = vector.broadcast %cst_63 : f32 to vector<2x512xf32>
    %184 = arith.mulf %182, %183 : vector<2x512xf32>
    %185 = math.tanh %184 : vector<2x512xf32>
    %cst_64 = arith.constant 1.000000e+00 : f32
    %186 = vector.broadcast %cst_64 : f32 to vector<2x512xf32>
    %187 = arith.addf %185, %186 : vector<2x512xf32>
    %cst_65 = arith.constant 5.000000e-01 : f32
    %188 = vector.broadcast %cst_65 : f32 to vector<2x512xf32>
    %189 = arith.mulf %188, %187 : vector<2x512xf32>
    %190 = math.tanh %182 : vector<2x512xf32>
    %191 = vector.extract_strided_slice %189 {offsets = [0, 0], sizes = [2, 128], strides = [1, 1]} : vector<2x512xf32> to vector<2x128xf32>
    %192 = vector.extract_strided_slice %189 {offsets = [0, 128], sizes = [2, 128], strides = [1, 1]} : vector<2x512xf32> to vector<2x128xf32>
    %193 = vector.extract_strided_slice %190 {offsets = [0, 256], sizes = [2, 128], strides = [1, 1]} : vector<2x512xf32> to vector<2x128xf32>
    %194 = vector.extract_strided_slice %189 {offsets = [0, 384], sizes = [2, 128], strides = [1, 1]} : vector<2x512xf32> to vector<2x128xf32>
    %195 = arith.mulf %192, %178 : vector<2x128xf32>
    %196 = arith.mulf %191, %193 : vector<2x128xf32>
    %197 = arith.addf %195, %196 : vector<2x128xf32>
    %198 = math.tanh %197 : vector<2x128xf32>
    %199 = arith.mulf %194, %198 : vector<2x128xf32>
    %c0_66 = arith.constant 0 : index
    %c0_67 = arith.constant 0 : index
    %200 = vector.load %arg6[%c0_66, %c0_67] : memref<2x128xf32, #tpu.memory_space<vmem>>, vector<2x128xf32>
    tpu.vector_store %arg6[%c0_66, %c0_67], %199 {strides = array<i32>} : memref<2x128xf32, #tpu.memory_space<vmem>>, vector<2x128xf32>,
    %c0_68 = arith.constant 0 : index
    %c0_69 = arith.constant 0 : index
    %201 = vector.load %arg7[%c0_68, %c0_69] : memref<2x128xf32, #tpu.memory_space<vmem>>, vector<2x128xf32>
    tpu.vector_store %arg7[%c0_68, %c0_69], %197 {strides = array<i32>} : memref<2x128xf32, #tpu.memory_space<vmem>>, vector<2x128xf32>,
    %c1_i32 = arith.constant 1 : i32
    %202 = arith.cmpi eq, %arg0, %c1_i32 : i32
    %203 = arith.extui %202 : i1 to i32
    %c0_i32_70 = arith.constant 0 : i32
    %204 = arith.cmpi ne, %203, %c0_i32_70 : i32
    scf.if %204 {
      %c0_71 = arith.constant 0 : index
      %c0_72 = arith.constant 0 : index
      %205 = vector.load %arg5[%c0_71, %c0_72] : memref<2x128xf32, #tpu.memory_space<vmem>>, vector<2x128xf32>
      tpu.vector_store %arg5[%c0_71, %c0_72], %199 {strides = array<i32>} : memref<2x128xf32, #tpu.memory_space<vmem>>, vector<2x128xf32>,
    } else {
    }
    return
  }
  func.func @transform_0(%arg0: i32) -> (i32, i32, i32) {
    %c0_i32 = arith.constant 0 : i32
    %c0_i32_0 = arith.constant 0 : i32
    %c0_i32_1 = arith.constant 0 : i32
    return %c0_i32, %arg0, %c0_i32_0 : i32, i32, i32
  }
  func.func @transform_1(%arg0: i32) -> (i32, i32) {
    %c0_i32 = arith.constant 0 : i32
    %c0_i32_0 = arith.constant 0 : i32
    %c0_i32_1 = arith.constant 0 : i32
    return %c0_i32, %c0_i32_0 : i32, i32
  }
  func.func @transform_2(%arg0: i32) -> (i32, i32) {
    %c0_i32 = arith.constant 0 : i32
    %c0_i32_0 = arith.constant 0 : i32
    %c0_i32_1 = arith.constant 0 : i32
    return %c0_i32, %c0_i32_0 : i32, i32
  }
  func.func @transform_3(%arg0: i32) -> (i32, i32) {
    %c0_i32 = arith.constant 0 : i32
    %c0_i32_0 = arith.constant 0 : i32
    %c0_i32_1 = arith.constant 0 : i32
    return %c0_i32, %c0_i32_0 : i32, i32
  }
  func.func @transform_4(%arg0: i32) -> (i32, i32) {
    %c0_i32 = arith.constant 0 : i32
    %c0_i32_0 = arith.constant 0 : i32
    %c0_i32_1 = arith.constant 0 : i32
    return %c0_i32, %c0_i32_0 : i32, i32
  }
}

</mosaic_0001>

<bundles_post_ra>
// kernel: tpu_custom_call.1
= control target key start
LH: loop header
LB: loop body
LE: loop exit
PB: predicated region body
PF: predicated region fallthrough
CT: control target
= control target key end

     0   :  { %9 = vsyncpa [#allocation5], 0  ;;  %s4651_s0 = inlined_call_operand.hbm [shape: f32[2,16,16], index: 0, kind: input, shape index: {}]   ;;  %s4652_s1 = inlined_call_operand.hbm [shape: f32[16,512], index: 1, kind: input, shape index: {}]   ;;  %s4653_s2 = inlined_call_operand.hbm [shape: f32[128,512], index: 2, kind: input, shape index: {}]   ;;  %s4654_s3 = inlined_call_operand.vmem [shape: f32[1,512], index: 3, kind: input, shape index: {}]   ;;  %s4655_s4 = inlined_call_operand.hbm [shape: f32[2,128], index: 4, kind: output, shape index: {}]  }
   0x1   :  { %11 = vsyncpa [#allocation5 + $0x1], 0 }
   0x2   :  { %12 = vsyncpa [#allocation8], 0 }
   0x3   :  { %13 = vsyncpa [#allocation6], 0  ;;  %s3950_s15 = smov 0   ;;  %s3952_s16 = smov 0  }
   0x4   :  { %s3954_s17 = smov 0   ;;  %s3956_s18 = smov 0  }
   0x5 LB: > { %s3969_s19 = sadd.s32 4294967295, %s3912_s18   ;;  %s3972_s20 = sadd.s32 1, %s3912_s18   ;;  %s3912_s18 = sphi %s3956_s18, %s4674_s18   ;;  %s3908_s17 = sphi %s3954_s17, %s4673_s17   ;;  %s3904_s16 = sphi %s3952_s16, %s4672_s16   ;;  %s3900_s15 = sphi %s3950_s15, %s4671_s15  }
   0x6   : > { %s23_s21 = ssub.s32 %s3912_s18, %s3972_s20  ;;  %s26_s22 = sadd.s32 1, %s3908_s17 }
   0x7   : > { %p24_p0 = scmp.eq.s32.totalorder %s23_s21, 0  ;;  %p33_p1 = scmp.ne.s32.totalorder %s3908_s17, %s3904_s16 }
   0x8   : > { %p34_p2 = scmp.eq.s32.totalorder %s3912_s18, 0  ;;  %p39_p3 = scmp.ne.s32.totalorder %s3904_s16, %s3900_s15 }
   0x9   : > { %s3982_s23 = scalar_select %p24_p0, %s3908_s17, %s26_s22  }
   0xa   : > { %p3984_p4 = por %p34_p2, %p33_p1  ;;  %p4656_p5 = scmp.eq.s32.totalorder %s3969_s19, 0 }
   0xb   : > { %p2932_p6 = scmp.ge.s32.totalorder %s3912_s18, 1  ;;  %p134_p7 = scmp.lt.s32.totalorder %s3912_s18, 3 }
   0xc   : > { %p3993_p8 = por %p4656_p5, %p39_p3  ;;  %s3914_s27 = smov [#allocation7]  }
   0xd   : > { %p3998_p10 = pnand %p2932_p6, %p134_p7  ;;  %s146_s28 = sshll.u32 %s3914_s27, 4  ;;  %s147_s28 = int_to_ptr.vmem [resolvable:$true] %s146_s28 }
   0xe   : > { %s4661_s25 = scalar_select %p3993_p8, 1, 0 }
   0xf   : > { %s4662_s26 = scalar_select %p3998_p10, 1, 0 }
  0x10   : > { %p3618_p11 = pneg %p3998_p10  ;;  %p3631_p13 = scmp.lt.s32.totalorder %s3912_s18, 2 }
  0x11   : > { %s176_s30 = sand.u32 1, %s3908_s17   ;;  %s3758_s8 = scalar_lea.hbm %s4652_s1, 1024 }
  0x12   : > { %p4006_p12 = pnand %p3618_p11, %p4656_p5  ;;  %p4014_p0 = pnand %p3631_p13, %p3984_p4 }
  0x13   : > { %p3759_p1 = scmp.ne.s32.totalorder %s4652_s1, %s3758_s8  ;;  %p3765_p4 = scmp.lt.u32.totalorder %s3758_s8, %s4652_s1 }
  0x14   : > { %s4664_s5 = scalar_select %p4014_p0, 1, 0 }
  0x15   : > { %p3760_p2 = pneg %p4006_p12 }
  0x17   : > { %p3761_p3 = pnand %p3760_p2, %p3759_p1 }
  0x19   : > { %p3762_p6 = pneg %p3761_p3 }
  0x1b   : > { %p3767_p7 = pnand %p3765_p4, %p3762_p6 }
  0x1d   : > { %3770 = shalt.err (!%p3767_p7)
}
  0x1e   : > { %s3771_s13 = scalar_lea.vmem %s147_s28, 1024  ;;  %p3779_p5 = scmp.lt.s32.totalorder %s147_s28, %s147_s28 }
  0x1f   : > { %p3772_p11 = scmp.ne.s32.totalorder %s147_s28, %s3771_s13  ;;  %p3780_p8 = scmp.lt.s32.totalorder %s3771_s13, %s3771_s13 }
  0x21   : > { %p3774_p13 = pnand %p3772_p11, %p3760_p2  ;;  %p3781_p10 = por %p3780_p8, %p3779_p5 }
  0x23   : > { %p3775_p9 = pneg %p3774_p13 }
  0x25   : > { %p3782_p0 = pnand %p3781_p10, %p3775_p9 }
  0x27   : > { %3785 = shalt.err (!%p3782_p0)
}
  0x28   : > { %s3915_s14 = smov 512   ;;  %s3916_s15 = smov 32  }
  0x29   : > { %3621 = dma.hbm_to_vmem [thread:$0]  (!%p4006_p12), %s4652_s1, 1024, %s147_s28, [#allocation8], %s3915_s14, %s3915_s14, %s3916_s15  }
  0x2a   : > { %s3917_s24 = smov [#allocation9]   ;;  %s3786_s8 = scalar_lea.hbm %s4653_s2, 8192 }
  0x2b   : > { %s159_s27 = sshll.u32 %s3917_s24, 4  ;;  %p3787_p5 = scmp.ne.s32.totalorder %s4653_s2, %s3786_s8  ;;  %s160_s27 = int_to_ptr.vmem [resolvable:$true] %s159_s27 }
  0x2c   : > { %p3793_p10 = scmp.lt.u32.totalorder %s3786_s8, %s4653_s2 }
  0x2d   : > { %p3789_p8 = pnand %p3787_p5, %p3760_p2 }
  0x2f   : > { %p3790_p9 = pneg %p3789_p8 }
  0x31   : > { %p3795_p0 = pnand %p3793_p10, %p3790_p9 }
  0x33   : > { %3798 = shalt.err (!%p3795_p0)
}
  0x34   : > { %s3799_s28 = scalar_lea.vmem %s160_s27, 8192  ;;  %p3807_p4 = scmp.lt.s32.totalorder %s160_s27, %s160_s27 }
  0x35   : > { %p3800_p1 = scmp.ne.s32.totalorder %s160_s27, %s3799_s28  ;;  %p3808_p7 = scmp.lt.s32.totalorder %s3799_s28, %s3799_s28 }
  0x37   : > { %p3802_p3 = pnand %p3800_p1, %p3760_p2  ;;  %p3809_p11 = por %p3808_p7, %p3807_p4 }
  0x39   : > { %p3803_p6 = pneg %p3802_p3 }
  0x3b   : > { %p3810_p13 = pnand %p3809_p11, %p3803_p6 }
  0x3d   : > { %3813 = shalt.err (!%p3810_p13)
}
  0x3e   : > { %3624 = dma.hbm_to_vmem [thread:$0]  (!%p4006_p12), %s4653_s2, 8192, %s160_s27, [#allocation8], %s3915_s14, %s3915_s14, %s3916_s15  }
  0x3f   : > { %s2936_s22 = sshll.u32 %s176_s30, 4  ;;  %s2937_s24 = sshll.u32 %s3912_s18, 7 }
  0x40   : > { %s4066_s8 = scalar_lea.hbm %s4651_s0, %s2937_s24  ;;  %s180_s29 = scalar_lea.vmem [#allocation4], %s2936_s22 }
  0x41   : > { %s186_s9 = sshll.u32 %s180_s29, 4  ;;  %s4072_s10 = scalar_lea.sflag [#allocation5], %s176_s30  ;;  %s4068_s9 = int_to_ptr.vmem [resolvable:$true] %s186_s9 }
  0x42   : > { %s3814_s14 = scalar_lea.hbm %s4066_s8, 256  ;;  %p4665_p2 = scmp.ne.s32.totalorder %s4664_s5, 0 }
  0x43   : > { %p3815_p12 = scmp.ne.s32.totalorder %s4066_s8, %s3814_s14  ;;  %s3819_s27 = scalar_lea.hbm %s4651_s0, 512 }
  0x44   : > { %p3816_p5 = pneg %p4665_p2  ;;  %p3820_p10 = scmp.lt.u32.totalorder %s4066_s8, %s4651_s0 }
  0x45   : > { %p3821_p0 = scmp.lt.u32.totalorder %s3819_s27, %s3814_s14  ;;  %p3823_p3 = scmp.lt.u32.totalorder %s3814_s14, %s4066_s8 }
  0x46   : > { %p3817_p8 = pnand %p3816_p5, %p3815_p12 }
  0x47   : > { %p3822_p1 = por %p3821_p0, %p3820_p10 }
  0x48   : > { %p3818_p9 = pneg %p3817_p8 }
  0x49   : > { %p3824_p6 = por %p3823_p3, %p3822_p1 }
  0x4b   : > { %p3825_p4 = pnand %p3824_p6, %p3818_p9 }
  0x4d   : > { %3828 = shalt.err (!%p3825_p4)
}
  0x4e   : > { %s3829_s30 = scalar_lea.vmem %s4068_s9, 256  ;;  %s3918_s28 = smov [#allocation4]  }
  0x4f   : > { %p3830_p7 = scmp.ne.s32.totalorder %s4068_s9, %s3829_s30  ;;  %s3834_s13 = sshll.u32 %s3918_s28, 4  ;;  %s3835_s13 = int_to_ptr.vmem [resolvable:$false] %s3834_s13 }
  0x50   : > { %s3836_s21 = scalar_lea.vmem %s3835_s13, 512  ;;  %p3837_p12 = scmp.lt.s32.totalorder %s4068_s9, %s3835_s13 }
  0x51   : > { %p3832_p11 = pnand %p3830_p7, %p3816_p5  ;;  %p3838_p8 = scmp.lt.s32.totalorder %s3836_s21, %s3829_s30 }
  0x53   : > { %p3833_p13 = pneg %p3832_p11  ;;  %p3839_p10 = por %p3838_p8, %p3837_p12 }
  0x55   : > { %p3840_p0 = pnand %p3839_p10, %p3833_p13 }
  0x57   : > { %3843 = shalt.err (!%p3840_p0)
}
  0x58   : > { %s3919_s22 = smov 256   ;;  %s3920_s24 = smov 128  }
  0x59   : > { %s3921_s6 = smov 8   ;;  %p4666_p5 = scmp.ne.s32.totalorder %s4662_s26, 0 }
  0x5a   : > { %3628 = dma.hbm_to_vmem [thread:$0]  (!%p4665_p2), %s4066_s8, 256, %s4068_s9, %s4072_s10, %s3919_s22, %s3920_s24, %s3921_s6  }
  0x5b   : > { %198 = sbr.rel (%p4666_p5) target bundleno = 2197 (0x895), region = 36  ;;  %s200_s7 = sand.u32 (!%p4666_p5), 1, %s3904_s16  }
  0x5c   : > { %s2939_s29 = sshll.u32 (!%p4666_p5), %s200_s7, 4  ;;  %s201_s14 = scalar_lea.sflag (!%p4666_p5), [#allocation5], %s200_s7 }
  0x5d   : > { %s4103_s18 = scalar_lea.vmem (!%p4666_p5), [#allocation4], %s2939_s29  ;;  %p4667_p9 = scmp.ne.s32.totalorder (!%p4666_p5), %s4661_s25, 0 }
  0x62   : > { %3887 = dma.done.wait (%p4667_p9), %s201_s14, 256  }
  0x63   : > { %3889 = vsyncadd (%p4667_p9), %s201_s14, 4294967040  ;;  %p4668_p1 = scmp.eq.s32.totalorder %s3969_s19, 0 }
  0x65   : > { %3891 = dma.done.wait (%p4668_p1), [#allocation8], 9216   ;;  %p4669_p2 = pmov %p4668_p1 }
  0x66   : > { %p4670_p3 = scmp.ne.s32.totalorder %s3969_s19, 0 }
  0x67   : > { %3893 = vsyncadd (%p4669_p2), [#allocation8], 4294958080  ;;  %v3922_v0 = vmov (!%p4670_p3), 0.0  }
  0x68   : > { %235 = sbr.rel (%p4670_p3) target bundleno = 111 (0x6f), region = 52  ;;  %236 = vst [vmem:[#allocation2] sm:$0x3] (!%p4670_p3), %v3922_v0  ;;  %237 = vst [vmem:[#allocation3] sm:$0x3] (!%p4670_p3), %v3922_v0 }
  0x6f PF: > { %v239_v1 = vld [vmem:[#allocation7 + $0x8] sm:$0xff]  ;;  %v241_v3 = vld [vmem:[#allocation7 + $0x18] sm:$0xff]  ;;  %v238_v6 = vld [vmem:[#allocation7] sm:$0xff]  ;;  %v3923_v8 = vmov 0.0   ;;  %vm337_vm0 = vcmask 1041409   ;;  %vm339_vm1 = vcmask 130048  }
  0x70   : > { %v243_v2 = vld [vmem:[#allocation7 + $0x28] sm:$0xff]  ;;  %v245_v5 = vld [vmem:[#allocation7 + $0x38] sm:$0xff]  ;;  %v242_v7 = vld [vmem:[#allocation7 + $0x20] sm:$0xff]  ;;  %406 = vmatprep.mubr.f32.mxu0 %v3923_v8  ;;  %477 = vmatprep.mubr.f32.mxu1 %v3923_v8  ;;  %p2959_p6 = scmp.ne.s32.totalorder %s3969_s19, 1 }
  0x71   : > { %v4115_v4 = vpack.c.bf16 %v243_v2, %v239_v1  ;;  %v4119_v9 = vpack.c.bf16 %v245_v5, %v241_v3  ;;  %v4121_v10 = vpack.c.bf16 %v242_v7, %v238_v6  ;;  %v240_v11 = vld [vmem:[#allocation7 + $0x10] sm:$0xff]  ;;  %v312_v15 = vld [vmem:[%s4103_s18 + $0x8] sm:$0x1]  ;;  %v485_v16 = vld [vmem:[%s4103_s18 + $0x9] sm:$0x1] }
  0x72   : > { %v244_v12 = vld [vmem:[#allocation7 + $0x30] sm:$0xff]  ;;  %v336_v17 = vrot.slane %v312_v15, 7  ;;  %v488_v18 = vrot.slane %v485_v16, 7  ;;  %v635_v20 = vld [vmem:[%s4103_s18 + $0xa] sm:$0x1]  ;;  %v246_v49 = vld [vmem:[#allocation9] sm:$0xff] }
  0x73   : > { %2965 = vmatprep.subr.bf16.mxu0 %v4115_v4  ;;  %v4124_v13 = vpack.c.bf16 %v244_v12, %v240_v11  ;;  %v311_v14 = vld [vmem:[%s4103_s18] sm:$0x1]  ;;  %2969 = vmatprep.subr.bf16.mxu1 %v4119_v9  ;;  %v484_v19 = vld [vmem:[%s4103_s18 + $0x1] sm:$0x1]  ;;  %v638_v23 = vrot.slane %v635_v20, 7  ;;  %v247_v42 = vld [vmem:[#allocation9 + $0x8] sm:$0xff] }
  0x74   : > { %2967 = vmatpush1.bf16.msra.mxu0 %v4121_v10  ;;  %v338_v21 = vsel %vm337_vm0, %v336_v17, %v311_v14  ;;  %v489_v22 = vsel %vm337_vm0, %v488_v18, %v484_v19  ;;  %v634_v24 = vld [vmem:[%s4103_s18 + $0x2] sm:$0x1]  ;;  %v785_v25 = vld [vmem:[%s4103_s18 + $0xb] sm:$0x1]  ;;  %v784_v28 = vld [vmem:[%s4103_s18 + $0x3] sm:$0x1] }
  0x75   : > { %2971 = vmatpush1.bf16.msra.mxu1 %v4124_v13  ;;  %2973 = vmatprep.subr.bf16.mxu0 %v4115_v4  ;;  %v639_v26 = vsel %vm337_vm0, %v638_v23, %v634_v24  ;;  %v788_v27 = vrot.slane %v785_v25, 7  ;;  %v935_v29 = vld [vmem:[%s4103_s18 + $0xc] sm:$0x1]  ;;  %v934_v32 = vld [vmem:[%s4103_s18 + $0x4] sm:$0x1] }
  0x76   : > { %2977 = vmatprep.subr.bf16.mxu1 %v4119_v9  ;;  %v938_v31 = vrot.slane %v935_v29, 7  ;;  %v1085_v33 = vld [vmem:[%s4103_s18 + $0xd] sm:$0x1]  ;;  %v1084_v36 = vld [vmem:[%s4103_s18 + $0x5] sm:$0x1] }
  0x77   : > { %2943 = vmatmul.mubr.msk.f32.vlgmr.msra.gmra.mrb[0].mxu0 %vm339_vm1, %v338_v21  ;;  %v789_v30 = vsel %vm337_vm0, %v788_v27, %v784_v28  ;;  %v1088_v35 = vrot.slane %v1085_v33, 7  ;;  %v1235_v37 = vld [vmem:[%s4103_s18 + $0xe] sm:$0x1]  ;;  %v1234_v40 = vld [vmem:[%s4103_s18 + $0x6] sm:$0x1] }
  0x78   : > { %2944 = vmatmul.mubr.msk.f32.vlgmr.msra.gmra.mrb[0].mxu1 %vm339_vm1, %v338_v21  ;;  %2975 = vmatpush1.bf16.msra.mxu0 %v4121_v10  ;;  %v939_v34 = vsel %vm337_vm0, %v938_v31, %v934_v32  ;;  %v1238_v39 = vrot.slane %v1235_v37, 7  ;;  %v1385_v41 = vld [vmem:[%s4103_s18 + $0xf] sm:$0x1]  ;;  %v1384_v47 = vld [vmem:[%s4103_s18 + $0x7] sm:$0x1] }
  0x79   : > { %2979 = vmatpush1.bf16.msra.mxu1 %v4124_v13  ;;  %556 = vmatprep.mubr.f32.mxu0 %v3923_v8  ;;  %v1089_v38 = vsel %vm337_vm0, %v1088_v35, %v1084_v36  ;;  %v251_v43 = vld [vmem:[#allocation9 + $0x28] sm:$0xff]  ;;  %v249_v45 = vld [vmem:[#allocation9 + $0x18] sm:$0xff]  ;;  %v1388_v48 = vrot.slane %v1385_v41, 7  ;;  %v250_v50 = vld [vmem:[#allocation9 + $0x20] sm:$0xff] }
  0x7a   : > { %627 = vmatprep.mubr.f32.mxu1 %v3923_v8  ;;  %2981 = vmatprep.subr.bf16.mxu0 %v4115_v4  ;;  %v1239_v44 = vsel %vm337_vm0, %v1238_v39, %v1234_v40  ;;  %v253_v46 = vld [vmem:[#allocation9 + $0x38] sm:$0xff]  ;;  %v248_v51 = vld [vmem:[#allocation9 + $0x10] sm:$0xff]  ;;  %v4201_v52 = vpack.c.bf16 %v251_v43, %v247_v42  ;;  %v255_v54 = vld [vmem:[#allocation9 + $0x48] sm:$0xff]  ;;  %v4210_v60 = vpack.c.bf16 %v250_v50, %v246_v49 }
  0x7b   : > { %2985 = vmatprep.subr.bf16.mxu1 %v4119_v9  ;;  %2945 = vmatmul.mubr.msk.f32.vlgmr.msra.gmra.mrb[2].mxu0 %vm339_vm1, %v489_v22  ;;  %v252_v53 = vld [vmem:[#allocation9 + $0x30] sm:$0xff]  ;;  %v259_v55 = vld [vmem:[#allocation9 + $0x68] sm:$0xff]  ;;  %v4205_v56 = vpack.c.bf16 %v253_v46, %v249_v45  ;;  %v257_v57 = vld [vmem:[#allocation9 + $0x58] sm:$0xff]  ;;  %v1389_v59 = vsel %vm337_vm0, %v1388_v48, %v1384_v47 }
  0x7c   : > { %2946 = vmatmul.mubr.msk.f32.vlgmr.msra.gmra.mrb[2].mxu1 %vm339_vm1, %v489_v22  ;;  %2983 = vmatpush1.bf16.msra.mxu0 %v4121_v10  ;;  %v261_v58 = vld [vmem:[#allocation9 + $0x78] sm:$0xff]  ;;  %v4214_v61 = vpack.c.bf16 %v252_v53, %v248_v51  ;;  %v4216_v62 = vpack.c.bf16 %v259_v55, %v255_v54  ;;  %v254_v63 = vld [vmem:[#allocation9 + $0x40] sm:$0xff]  ;;  %v256_v1 = vld [vmem:[#allocation9 + $0x50] sm:$0xff] }
  0x7d   : > { %2987 = vmatpush1.bf16.msra.mxu1 %v4124_v13  ;;  %706 = vmatprep.mubr.f32.mxu0 %v3923_v8  ;;  %v258_v0 = vld [vmem:[#allocation9 + $0x60] sm:$0xff]  ;;  %v4220_v2 = vpack.c.bf16 %v261_v58, %v257_v57  ;;  %v260_v3 = vld [vmem:[#allocation9 + $0x70] sm:$0xff]  ;;  %v267_v5 = vld [vmem:[#allocation9 + $0xa8] sm:$0xff] }
  0x7e   : > { %777 = vmatprep.mubr.f32.mxu1 %v3923_v8  ;;  %2989 = vmatprep.subr.bf16.mxu0 %v4115_v4  ;;  %v265_v6 = vld [vmem:[#allocation9 + $0x98] sm:$0xff]  ;;  %v262_v12 = vld [vmem:[#allocation9 + $0x80] sm:$0xff]  ;;  %v264_v14 = vld [vmem:[#allocation9 + $0x90] sm:$0xff] }
  0x7f   : > { %2993 = vmatprep.subr.bf16.mxu1 %v4119_v9  ;;  %2947 = vmatmul.mubr.msk.f32.vlgmr.msra.gmra.mrb[4].mxu0 %vm339_vm1, %v639_v26  ;;  %v269_v7 = vld [vmem:[#allocation9 + $0xb8] sm:$0xff]  ;;  %v268_v16 = vld [vmem:[#allocation9 + $0xb0] sm:$0xff]  ;;  %v271_v17 = vld [vmem:[#allocation9 + $0xc8] sm:$0xff] }
  0x80   : > { %2948 = vmatmul.mubr.msk.f32.vlgmr.msra.gmra.mrb[4].mxu1 %vm339_vm1, %v639_v26  ;;  %2991 = vmatpush1.bf16.msra.mxu0 %v4121_v10  ;;  %v4235_v15 = vpack.c.bf16 %v269_v7, %v265_v6  ;;  %v275_v18 = vld [vmem:[#allocation9 + $0xe8] sm:$0xff]  ;;  %v273_v19 = vld [vmem:[#allocation9 + $0xd8] sm:$0xff]  ;;  %v4244_v22 = vpack.c.bf16 %v268_v16, %v264_v14  ;;  %v270_v24 = vld [vmem:[#allocation9 + $0xc0] sm:$0xff] }
  0x81   : > { %2995 = vmatpush1.bf16.msra.mxu1 %v4124_v13  ;;  %856 = vmatprep.mubr.f32.mxu0 %v3923_v8  ;;  %v277_v20 = vld [vmem:[#allocation9 + $0xf8] sm:$0xff]  ;;  %v4246_v23 = vpack.c.bf16 %v275_v18, %v271_v17  ;;  %v274_v25 = vld [vmem:[#allocation9 + $0xe0] sm:$0xff]  ;;  %v272_v26 = vld [vmem:[#allocation9 + $0xd0] sm:$0xff] }
  0x82   : > { %927 = vmatprep.mubr.f32.mxu1 %v3923_v8  ;;  %2997 = vmatprep.subr.bf16.mxu0 %v4115_v4  ;;  %v4249_v27 = vpack.c.bf16 %v277_v20, %v273_v19  ;;  %v276_v28 = vld [vmem:[#allocation9 + $0xf0] sm:$0xff]  ;;  %v279_v29 = vld [vmem:[#allocation9 + $0x108] sm:$0xff]  ;;  %v281_v31 = vld [vmem:[#allocation9 + $0x118] sm:$0xff]  ;;  %v4252_v33 = vpack.c.bf16 %v274_v25, %v270_v24 }
  0x83   : > { %3001 = vmatprep.subr.bf16.mxu1 %v4119_v9  ;;  %2949 = vmatmul.mubr.msk.f32.vlgmr.msra.gmra.mrb[6].mxu0 %vm339_vm1, %v789_v30  ;;  %v285_v32 = vld [vmem:[#allocation9 + $0x138] sm:$0xff]  ;;  %v278_v36 = vld [vmem:[#allocation9 + $0x100] sm:$0xff]  ;;  %v284_v40 = vld [vmem:[#allocation9 + $0x130] sm:$0xff] }
  0x84   : > { %2950 = vmatmul.mubr.msk.f32.vlgmr.msra.gmra.mrb[6].mxu1 %vm339_vm1, %v789_v30  ;;  %2999 = vmatpush1.bf16.msra.mxu0 %v4121_v10  ;;  %v283_v30 = vld [vmem:[#allocation9 + $0x128] sm:$0xff]  ;;  %v282_v37 = vld [vmem:[#allocation9 + $0x120] sm:$0xff]  ;;  %v4261_v39 = vpack.c.bf16 %v285_v32, %v281_v31  ;;  %v289_v43 = vld [vmem:[#allocation9 + $0x158] sm:$0xff]  ;;  %v314_v31 = vlaneseq }
  0x85   : > { %3003 = vmatpush1.bf16.msra.mxu1 %v4124_v13  ;;  %1006 = vmatprep.mubr.f32.mxu0 %v3923_v8  ;;  %v4258_v35 = vpack.c.bf16 %v283_v30, %v279_v29  ;;  %v287_v41 = vld [vmem:[#allocation9 + $0x148] sm:$0xff]  ;;  %v4264_v45 = vpack.c.bf16 %v282_v37, %v278_v36  ;;  %v286_v48 = vld [vmem:[#allocation9 + $0x140] sm:$0xff]  ;;  %v288_v50 = vld [vmem:[#allocation9 + $0x150] sm:$0xff] }
  0x86   : > { %1077 = vmatprep.mubr.f32.mxu1 %v3923_v8  ;;  %3005 = vmatprep.subr.bf16.mxu0 %v4115_v4  ;;  %v291_v42 = vld [vmem:[#allocation9 + $0x168] sm:$0xff]  ;;  %v290_v49 = vld [vmem:[#allocation9 + $0x160] sm:$0xff]  ;;  %v292_v53 = vld [vmem:[#allocation9 + $0x170] sm:$0xff]  ;;  %v315_v32 = vshrl.u32 %v314_v31, 7 }
  0x87   : > { %3009 = vmatprep.subr.bf16.mxu1 %v4119_v9  ;;  %2951 = vmatmul.mubr.msk.f32.vlgmr.msra.gmra.mrb[8].mxu0 %vm339_vm1, %v939_v34  ;;  %v4270_v47 = vpack.c.bf16 %v291_v42, %v287_v41  ;;  %v295_v54 = vld [vmem:[#allocation9 + $0x188] sm:$0xff]  ;;  %v297_v57 = vld [vmem:[#allocation9 + $0x198] sm:$0xff]  ;;  %v300_v6 = vld [vmem:[#allocation9 + $0x1b0] sm:$0xff] }
  0x88   : > { %2952 = vmatmul.mubr.msk.f32.vlgmr.msra.gmra.mrb[8].mxu1 %vm339_vm1, %v939_v34  ;;  %3007 = vmatpush1.bf16.msra.mxu0 %v4121_v10  ;;  %v4256_v34 = vpack.c.bf16 %v276_v28, %v272_v26  ;;  %v299_v55 = vld [vmem:[#allocation9 + $0x1a8] sm:$0xff]  ;;  %v301_v58 = vld [vmem:[#allocation9 + $0x1b8] sm:$0xff]  ;;  %v302_v19 = vld [vmem:[#allocation9 + $0x1c0] sm:$0xff]  ;;  %v316_v36 = vsub.s32 0, %v315_v32  ;;  %v324_v41 = vsub.s32 2, %v315_v32 }
  0x89   : > { %3011 = vmatpush1.bf16.msra.mxu1 %v4124_v13  ;;  %1156 = vmatprep.mubr.f32.mxu0 %v3923_v8  ;;  %v303_v7 = vld [vmem:[#allocation9 + $0x1c8] sm:$0xff]  ;;  %v309_v14 = vld [vmem:[#allocation9 + $0x1f8] sm:$0xff]  ;;  %v306_v20 = vld [vmem:[#allocation9 + $0x1e0] sm:$0xff] }
  0x8a   : > { %1227 = vmatprep.mubr.f32.mxu1 %v3923_v8  ;;  %3013 = vmatprep.subr.bf16.mxu0 %v4115_v4  ;;  %v304_v25 = vld [vmem:[#allocation9 + $0x1d0] sm:$0xff]  ;;  %v4300_v28 = vpack.c.bf16 %v306_v20, %v302_v19  ;;  %v1534_v30 = vld [vmem:[#allocation2] sm:$0x3]  ;;  %v1535_v20 = vld [vmem:[#allocation3] sm:$0x3] }
  0x8b   : > { %3017 = vmatprep.subr.bf16.mxu1 %v4119_v9  ;;  %2953 = vmatmul.mubr.msk.f32.vlgmr.msra.gmra.mrb[10].mxu0 %vm339_vm1, %v1089_v38  ;;  %v308_v26 = vld [vmem:[#allocation9 + $0x1f0] sm:$0xff]  ;;  %v310_v37 = vld [vmem:[%s4654_s3] sm:$0xf] }
  0x8c   : > { %2954 = vmatmul.mubr.msk.f32.vlgmr.msra.gmra.mrb[10].mxu1 %vm339_vm1, %v1089_v38  ;;  %3015 = vmatpush1.bf16.msra.mxu0 %v4121_v10  ;;  %v280_v38 = vld [vmem:[#allocation9 + $0x110] sm:$0xff]  ;;  %v4304_v29 = vpack.c.bf16 %v308_v26, %v304_v25 }
  0x8d   : > { %3019 = vmatpush1.bf16.msra.mxu1 %v4124_v13  ;;  %1306 = vmatprep.mubr.f32.mxu0 %v3923_v8  ;;  %v4268_v46 = vpack.c.bf16 %v284_v40, %v280_v38  ;;  %v320_v38 = vsub.s32 1, %v315_v32  ;;  %v4348_v40 = vrot.slane %v310_v37, %v316_v36 }
  0x8e   : > { %1377 = vmatprep.mubr.f32.mxu1 %v3923_v8  ;;  %3021 = vmatprep.subr.bf16.mxu0 %v4115_v4  ;;  %v263_v4 = vld [vmem:[#allocation9 + $0x88] sm:$0xff] }
  0x8f   : > { %3025 = vmatprep.subr.bf16.mxu1 %v4119_v9  ;;  %2955 = vmatmul.mubr.msk.f32.vlgmr.msra.gmra.mrb[12].mxu0 %vm339_vm1, %v1239_v44  ;;  %v4226_v9 = vpack.c.bf16 %v258_v0, %v254_v63  ;;  %v4232_v11 = vpack.c.bf16 %v267_v5, %v263_v4  ;;  %v4280_v63 = vpack.c.bf16 %v292_v53, %v288_v50  ;;  %v296_v4 = vld [vmem:[#allocation9 + $0x190] sm:$0xff]  ;;  %v328_v53 = vsub.s32 3, %v315_v32 }
  0x90   : > { %2956 = vmatmul.mubr.msk.f32.vlgmr.msra.gmra.mrb[12].mxu1 %vm339_vm1, %v1239_v44  ;;  %3023 = vmatpush1.bf16.msra.mxu0 %v4121_v10  ;;  %v4230_v10 = vpack.c.bf16 %v260_v3, %v256_v1  ;;  %v293_v44 = vld [vmem:[#allocation9 + $0x178] sm:$0xff]  ;;  %v4282_v0 = vpack.c.bf16 %v299_v55, %v295_v54  ;;  %v294_v1 = vld [vmem:[#allocation9 + $0x180] sm:$0xff]  ;;  %v4285_v5 = vpack.c.bf16 %v301_v58, %v297_v57 }
  0x91   : > { %3027 = vmatpush1.bf16.msra.mxu1 %v4124_v13  ;;  %1456 = vmatprep.mubr.f32.mxu0 %v3923_v8  ;;  %v266_v13 = vld [vmem:[#allocation9 + $0xa0] sm:$0xff]  ;;  %v4273_v51 = vpack.c.bf16 %v293_v44, %v289_v43  ;;  %v4292_v17 = vpack.c.bf16 %v300_v6, %v296_v4  ;;  %v4350_v42 = vrot.slane %v310_v37, %v320_v38 }
  0x92   : > { %1527 = vmatprep.mubr.f32.mxu1 %v3923_v8  ;;  %3029 = vmatprep.subr.bf16.mxu0 %v4201_v52  ;;  %v4240_v21 = vpack.c.bf16 %v266_v13, %v262_v12  ;;  %v298_v3 = vld [vmem:[#allocation9 + $0x1a0] sm:$0xff]  ;;  %v307_v12 = vld [vmem:[#allocation9 + $0x1e8] sm:$0xff]  ;;  %v305_v13 = vld [vmem:[#allocation9 + $0x1d8] sm:$0xff] }
  0x93   : > { %3061 = vmatprep.subr.bf16.mxu1 %v4205_v56  ;;  %2957 = vmatmul.mubr.msk.f32.vlgmr.msra.gmra.mrb[14].mxu0 %vm339_vm1, %v1389_v59  ;;  %v4288_v16 = vpack.c.bf16 %v298_v3, %v294_v1  ;;  %v4294_v18 = vpack.c.bf16 %v307_v12, %v303_v7  ;;  %v4297_v24 = vpack.c.bf16 %v309_v14, %v305_v13 }
  0x94   : > { %2958 = vmatmul.mubr.msk.f32.vlgmr.msra.gmra.mrb[14].mxu1 %vm339_vm1, %v1389_v59  ;;  %3031 = vmatpush1.bf16.msra.mxu0 %v4210_v60  ;;  %v4276_v59 = vpack.c.bf16 %v290_v49, %v286_v48  ;;  %v4353_v48 = vrot.slane %v310_v37, %v324_v41  ;;  %v4357_v3 = vrot.slane %v310_v37, %v328_v53 }
  0x95   : > { %3063 = vmatpush1.bf16.msra.mxu1 %v4214_v61  ;;  %3033 = vmatprep.subr.bf16.mxu0 %v4216_v62 }
  0x96   : > { %3065 = vmatprep.subr.bf16.mxu1 %v4220_v2  ;;  %1600 = vmatprep.mubr.f32.mxu0 %v3923_v8 }
  0x97   : > { %1671 = vmatprep.mubr.f32.mxu1 %v3923_v8 }
  0x98   : > { %3035 = vmatpush1.bf16.msra.mxu0 %v4226_v9 }
  0x99   : > { %3067 = vmatpush1.bf16.msra.mxu1 %v4230_v10  ;;  %3037 = vmatprep.subr.bf16.mxu0 %v4232_v11 }
  0x9a   : > { %3069 = vmatprep.subr.bf16.mxu1 %v4235_v15 }
  0x9c   : > { %3039 = vmatpush1.bf16.msra.mxu0 %v4240_v21 }
  0x9d   : > { %3071 = vmatpush1.bf16.msra.mxu1 %v4244_v22  ;;  %3041 = vmatprep.subr.bf16.mxu0 %v4246_v23 }
  0x9e   : > { %3073 = vmatprep.subr.bf16.mxu1 %v4249_v27 }
  0xa0   : > { %3043 = vmatpush1.bf16.msra.mxu0 %v4252_v33 }
  0xa1   : > { %3075 = vmatpush1.bf16.msra.mxu1 %v4256_v34  ;;  %3045 = vmatprep.subr.bf16.mxu0 %v4258_v35 }
  0xa2   : > { %3077 = vmatprep.subr.bf16.mxu1 %v4261_v39 }
  0xa4   : > { %3047 = vmatpush1.bf16.msra.mxu0 %v4264_v45 }
  0xa5   : > { %3079 = vmatpush1.bf16.msra.mxu1 %v4268_v46  ;;  %3049 = vmatprep.subr.bf16.mxu0 %v4270_v47 }
  0xa6   : > { %3081 = vmatprep.subr.bf16.mxu1 %v4273_v51 }
  0xa8   : > { %3051 = vmatpush1.bf16.msra.mxu0 %v4276_v59 }
  0xa9   : > { %3083 = vmatpush1.bf16.msra.mxu1 %v4280_v63  ;;  %3053 = vmatprep.subr.bf16.mxu0 %v4282_v0 }
  0xaa   : > { %3085 = vmatprep.subr.bf16.mxu1 %v4285_v5 }
  0xac   : > { %3055 = vmatpush1.bf16.msra.mxu0 %v4288_v16 }
  0xad   : > { %3087 = vmatpush1.bf16.msra.mxu1 %v4292_v17  ;;  %3057 = vmatprep.subr.bf16.mxu0 %v4294_v18 }
  0xae   : > { %3089 = vmatprep.subr.bf16.mxu1 %v4297_v24 }
  0xb0   : > { %3059 = vmatpush1.bf16.msra.mxu0 %v4300_v28 }
  0xb1   : > { %3091 = vmatpush1.bf16.msra.mxu1 %v4304_v29  ;;  %3093 = vmatprep.subr.bf16.mxu0 %v4201_v52 }
  0xb2   : > { %3125 = vmatprep.subr.bf16.mxu1 %v4205_v56 }
  0xb3   : > { %1601 = vmatmul.mubr.f32.vlgmr.msra.gmra.mrb[0].mxu0 %v1534_v30 }
  0xb4   : > { %1672 = vmatmul.mubr.f32.vlgmr.msra.gmra.mrb[0].mxu1 %v1534_v30  ;;  %3095 = vmatpush1.bf16.msra.mxu0 %v4210_v60 }
  0xb5   : > { %3127 = vmatpush1.bf16.msra.mxu1 %v4214_v61  ;;  %3097 = vmatprep.subr.bf16.mxu0 %v4216_v62 }
  0xb6   : > { %3129 = vmatprep.subr.bf16.mxu1 %v4220_v2  ;;  %1764 = vmatprep.mubr.f32.mxu0 %v3923_v8 }
  0xb7   : > { %1835 = vmatprep.mubr.f32.mxu1 %v3923_v8 }
  0xb8   : > { %3099 = vmatpush1.bf16.msra.mxu0 %v4226_v9 }
  0xb9   : > { %3131 = vmatpush1.bf16.msra.mxu1 %v4230_v10  ;;  %3101 = vmatprep.subr.bf16.mxu0 %v4232_v11 }
  0xba   : > { %3133 = vmatprep.subr.bf16.mxu1 %v4235_v15 }
  0xbc   : > { %3103 = vmatpush1.bf16.msra.mxu0 %v4240_v21 }
  0xbd   : > { %3135 = vmatpush1.bf16.msra.mxu1 %v4244_v22  ;;  %3105 = vmatprep.subr.bf16.mxu0 %v4246_v23 }
  0xbe   : > { %3137 = vmatprep.subr.bf16.mxu1 %v4249_v27 }
  0xc0   : > { %3107 = vmatpush1.bf16.msra.mxu0 %v4252_v33 }
  0xc1   : > { %3139 = vmatpush1.bf16.msra.mxu1 %v4256_v34  ;;  %3109 = vmatprep.subr.bf16.mxu0 %v4258_v35 }
  0xc2   : > { %3141 = vmatprep.subr.bf16.mxu1 %v4261_v39 }
  0xc4   : > { %3111 = vmatpush1.bf16.msra.mxu0 %v4264_v45 }
  0xc5   : > { %3143 = vmatpush1.bf16.msra.mxu1 %v4268_v46  ;;  %3113 = vmatprep.subr.bf16.mxu0 %v4270_v47 }
  0xc6   : > { %3145 = vmatprep.subr.bf16.mxu1 %v4273_v51 }
  0xc8   : > { %3115 = vmatpush1.bf16.msra.mxu0 %v4276_v59 }
  0xc9   : > { %3147 = vmatpush1.bf16.msra.mxu1 %v4280_v63  ;;  %3117 = vmatprep.subr.bf16.mxu0 %v4282_v0 }
  0xca   : > { %3149 = vmatprep.subr.bf16.mxu1 %v4285_v5 }
  0xcc   : > { %3119 = vmatpush1.bf16.msra.mxu0 %v4288_v16 }
  0xcd   : > { %3151 = vmatpush1.bf16.msra.mxu1 %v4292_v17  ;;  %3121 = vmatprep.subr.bf16.mxu0 %v4294_v18 }
  0xce   : > { %3153 = vmatprep.subr.bf16.mxu1 %v4297_v24 }
  0xd0   : > { %3123 = vmatpush1.bf16.msra.mxu0 %v4300_v28 }
  0xd1   : > { %3155 = vmatpush1.bf16.msra.mxu1 %v4304_v29  ;;  %3157 = vmatprep.subr.bf16.mxu0 %v4201_v52 }
  0xd2   : > { %3189 = vmatprep.subr.bf16.mxu1 %v4205_v56 }
 0x186   : > { %v1602_v43 = vpop.f32.mrb[0].mxu0 }
 0x187   : > { %v3540_v44 = vadd.f32 %v1602_v43, %v4348_v40  ;;  %v1673_v49 = vpop.f32.mrb[0].mxu1  ;;  %v1604_v50 = vpop.f32.mrb[1].mxu0 }
 0x188   : > { %v3541_v54 = vadd.f32 %v1604_v50, %v4350_v42  ;;  %v1675_v55 = vpop.f32.mrb[1].mxu1  ;;  %v3542_v1 = vadd.f32 %v1673_v49, %v4353_v48 }
 0x189   : > { %v1682_v57 = vmul.f32 0.5, %v3540_v44  ;;  %v3543_v4 = vadd.f32 %v1675_v55, %v4357_v3 }
 0x18a   : > { %v1683_v58 = vmul.f32 0.5, %v3541_v54 }
 0x18b   : > { %3678 = vtanh.f32 %v1682_v57  ;;  %v1684_v6 = vmul.f32 0.5, %v3543_v4 }
 0x18c   : > { %3680 = vtanh.f32 %v1683_v58 }
 0x18d   : > { %3682 = vtanh.f32 %v3542_v1 }
 0x18e   : > { %3684 = vtanh.f32 %v1684_v6 }
 0x195   : > { %v3679_v7 = vpop.eup %3678 }
 0x196   : > { %v3681_v12 = vpop.eup %3680  ;;  %v1688_v13 = vadd.f32 1.0, %v3679_v7 }
 0x197   : > { %v1689_v14 = vadd.f32 1.0, %v3681_v12  ;;  %v3683_v25 = vpop.eup %3682 }
 0x198   : > { %v1691_v19 = vmul.f32 0.5, %v1688_v13  ;;  %v3685_v36 = vpop.eup %3684 }
 0x199   : > { %v1692_v26 = vmul.f32 0.5, %v1689_v14  ;;  %v1690_v37 = vadd.f32 1.0, %v3685_v36 }
 0x19a   : > { %v1696_v30 = vmul.f32 %v3683_v25, %v1691_v19 }
 0x19b   : > { %v1695_v31 = vmul.f32 %v1692_v26, %v1535_v20  ;;  %v1693_v38 = vmul.f32 0.5, %v1690_v37 }
 0x19d   : > { %v4360_v32 = vadd.f32 %v1696_v30, %v1695_v31 }
 0x19f   : > { %3686 = vtanh.f32 %v4360_v32 }
 0x1a9   : > { %v3687_v41 = vpop.eup %3686 }
 0x1aa   : > { %v1699_v43 = vmul.f32 %v3687_v41, %v1693_v38 }
 0x1ac   : > { %1765 = vmatmul.mubr.f32.vlgmr.msra.gmra.mrb[2].mxu0 %v1699_v43  ;;  %1836 = vmatmul.mubr.f32.vlgmr.msra.gmra.mrb[2].mxu1 %v1699_v43 }
 0x1ad   : > { %3159 = vmatpush1.bf16.msra.mxu0 %v4210_v60  ;;  %3191 = vmatpush1.bf16.msra.mxu1 %v4214_v61 }
 0x1ae   : > { %3161 = vmatprep.subr.bf16.mxu0 %v4216_v62  ;;  %3193 = vmatprep.subr.bf16.mxu1 %v4220_v2 }
 0x1af   : > { %1928 = vmatprep.mubr.f32.mxu0 %v3923_v8  ;;  %1999 = vmatprep.mubr.f32.mxu1 %v3923_v8 }
 0x1b1   : > { %3163 = vmatpush1.bf16.msra.mxu0 %v4226_v9  ;;  %3195 = vmatpush1.bf16.msra.mxu1 %v4230_v10 }
 0x1b2   : > { %3165 = vmatprep.subr.bf16.mxu0 %v4232_v11  ;;  %3197 = vmatprep.subr.bf16.mxu1 %v4235_v15 }
 0x1b5   : > { %3167 = vmatpush1.bf16.msra.mxu0 %v4240_v21  ;;  %3199 = vmatpush1.bf16.msra.mxu1 %v4244_v22 }
 0x1b6   : > { %3169 = vmatprep.subr.bf16.mxu0 %v4246_v23  ;;  %3201 = vmatprep.subr.bf16.mxu1 %v4249_v27 }
 0x1b9   : > { %3171 = vmatpush1.bf16.msra.mxu0 %v4252_v33  ;;  %3203 = vmatpush1.bf16.msra.mxu1 %v4256_v34 }
 0x1ba   : > { %3173 = vmatprep.subr.bf16.mxu0 %v4258_v35  ;;  %3205 = vmatprep.subr.bf16.mxu1 %v4261_v39 }
 0x1bd   : > { %3175 = vmatpush1.bf16.msra.mxu0 %v4264_v45  ;;  %3207 = vmatpush1.bf16.msra.mxu1 %v4268_v46 }
 0x1be   : > { %3177 = vmatprep.subr.bf16.mxu0 %v4270_v47  ;;  %3209 = vmatprep.subr.bf16.mxu1 %v4273_v51 }
 0x1c1   : > { %3179 = vmatpush1.bf16.msra.mxu0 %v4276_v59  ;;  %3211 = vmatpush1.bf16.msra.mxu1 %v4280_v63 }
 0x1c2   : > { %3181 = vmatprep.subr.bf16.mxu0 %v4282_v0  ;;  %3213 = vmatprep.subr.bf16.mxu1 %v4285_v5 }
 0x1c5   : > { %3183 = vmatpush1.bf16.msra.mxu0 %v4288_v16  ;;  %3215 = vmatpush1.bf16.msra.mxu1 %v4292_v17 }
 0x1c6   : > { %3185 = vmatprep.subr.bf16.mxu0 %v4294_v18  ;;  %3217 = vmatprep.subr.bf16.mxu1 %v4297_v24 }
 0x1c9   : > { %3187 = vmatpush1.bf16.msra.mxu0 %v4300_v28  ;;  %3219 = vmatpush1.bf16.msra.mxu1 %v4304_v29 }
 0x1ca   : > { %3221 = vmatprep.subr.bf16.mxu0 %v4201_v52  ;;  %3253 = vmatprep.subr.bf16.mxu1 %v4205_v56 }
 0x27f   : > { %v1766_v44 = vpop.f32.mrb[2].mxu0  ;;  %v1837_v49 = vpop.f32.mrb[2].mxu1 }
 0x280   : > { %v3544_v50 = vadd.f32 %v1766_v44, %v4348_v40  ;;  %v1768_v53 = vpop.f32.mrb[3].mxu0  ;;  %v1839_v54 = vpop.f32.mrb[3].mxu1  ;;  %v3546_v1 = vadd.f32 %v1837_v49, %v4353_v48 }
 0x281   : > { %v3545_v55 = vadd.f32 %v1768_v53, %v4350_v42  ;;  %v3547_v4 = vadd.f32 %v1839_v54, %v4357_v3 }
 0x282   : > { %v1846_v57 = vmul.f32 0.5, %v3544_v50 }
 0x283   : > { %v1847_v58 = vmul.f32 0.5, %v3545_v55  ;;  %v1848_v6 = vmul.f32 0.5, %v3547_v4 }
 0x284   : > { %3688 = vtanh.f32 %v1846_v57 }
 0x285   : > { %3690 = vtanh.f32 %v1847_v58 }
 0x286   : > { %3692 = vtanh.f32 %v3546_v1 }
 0x287   : > { %3694 = vtanh.f32 %v1848_v6 }
 0x28e   : > { %v3689_v7 = vpop.eup %3688 }
 0x28f   : > { %v3691_v12 = vpop.eup %3690  ;;  %v1852_v13 = vadd.f32 1.0, %v3689_v7 }
 0x290   : > { %v1853_v14 = vadd.f32 1.0, %v3691_v12  ;;  %v3693_v20 = vpop.eup %3692 }
 0x291   : > { %v1855_v19 = vmul.f32 0.5, %v1852_v13  ;;  %v3695_v36 = vpop.eup %3694 }
 0x292   : > { %v1856_v25 = vmul.f32 0.5, %v1853_v14  ;;  %v1854_v37 = vadd.f32 1.0, %v3695_v36 }
 0x293   : > { %v1860_v26 = vmul.f32 %v3693_v20, %v1855_v19 }
 0x294   : > { %v1859_v30 = vmul.f32 %v1856_v25, %v4360_v32  ;;  %v1857_v38 = vmul.f32 0.5, %v1854_v37 }
 0x296   : > { %v4402_v31 = vadd.f32 %v1860_v26, %v1859_v30 }
 0x298   : > { %3696 = vtanh.f32 %v4402_v31 }
 0x2a2   : > { %v3697_v41 = vpop.eup %3696 }
 0x2a3   : > { %v1863_v43 = vmul.f32 %v3697_v41, %v1857_v38 }
 0x2a5   : > { %1929 = vmatmul.mubr.f32.vlgmr.msra.gmra.mrb[4].mxu0 %v1863_v43  ;;  %2000 = vmatmul.mubr.f32.vlgmr.msra.gmra.mrb[4].mxu1 %v1863_v43 }
 0x2a6   : > { %3223 = vmatpush1.bf16.msra.mxu0 %v4210_v60  ;;  %3255 = vmatpush1.bf16.msra.mxu1 %v4214_v61 }
 0x2a7   : > { %3225 = vmatprep.subr.bf16.mxu0 %v4216_v62  ;;  %3257 = vmatprep.subr.bf16.mxu1 %v4220_v2 }
 0x2a8   : > { %2092 = vmatprep.mubr.f32.mxu0 %v3923_v8  ;;  %2163 = vmatprep.mubr.f32.mxu1 %v3923_v8 }
 0x2aa   : > { %3227 = vmatpush1.bf16.msra.mxu0 %v4226_v9  ;;  %3259 = vmatpush1.bf16.msra.mxu1 %v4230_v10 }
 0x2ab   : > { %3229 = vmatprep.subr.bf16.mxu0 %v4232_v11  ;;  %3261 = vmatprep.subr.bf16.mxu1 %v4235_v15 }
 0x2ae   : > { %3231 = vmatpush1.bf16.msra.mxu0 %v4240_v21  ;;  %3263 = vmatpush1.bf16.msra.mxu1 %v4244_v22 }
 0x2af   : > { %3233 = vmatprep.subr.bf16.mxu0 %v4246_v23  ;;  %3265 = vmatprep.subr.bf16.mxu1 %v4249_v27 }
 0x2b2   : > { %3235 = vmatpush1.bf16.msra.mxu0 %v4252_v33  ;;  %3267 = vmatpush1.bf16.msra.mxu1 %v4256_v34 }
 0x2b3   : > { %3237 = vmatprep.subr.bf16.mxu0 %v4258_v35  ;;  %3269 = vmatprep.subr.bf16.mxu1 %v4261_v39 }
 0x2b6   : > { %3239 = vmatpush1.bf16.msra.mxu0 %v4264_v45  ;;  %3271 = vmatpush1.bf16.msra.mxu1 %v4268_v46 }
 0x2b7   : > { %3241 = vmatprep.subr.bf16.mxu0 %v4270_v47  ;;  %3273 = vmatprep.subr.bf16.mxu1 %v4273_v51 }
 0x2ba   : > { %3243 = vmatpush1.bf16.msra.mxu0 %v4276_v59  ;;  %3275 = vmatpush1.bf16.msra.mxu1 %v4280_v63 }
 0x2bb   : > { %3245 = vmatprep.subr.bf16.mxu0 %v4282_v0  ;;  %3277 = vmatprep.subr.bf16.mxu1 %v4285_v5 }
 0x2be   : > { %3247 = vmatpush1.bf16.msra.mxu0 %v4288_v16  ;;  %3279 = vmatpush1.bf16.msra.mxu1 %v4292_v17 }
 0x2bf   : > { %3249 = vmatprep.subr.bf16.mxu0 %v4294_v18  ;;  %3281 = vmatprep.subr.bf16.mxu1 %v4297_v24 }
 0x2c2   : > { %3251 = vmatpush1.bf16.msra.mxu0 %v4300_v28  ;;  %3283 = vmatpush1.bf16.msra.mxu1 %v4304_v29 }
 0x2c3   : > { %3285 = vmatprep.subr.bf16.mxu0 %v4201_v52  ;;  %3317 = vmatprep.subr.bf16.mxu1 %v4205_v56 }
 0x378   : > { %v1930_v32 = vpop.f32.mrb[4].mxu0  ;;  %v2001_v44 = vpop.f32.mrb[4].mxu1 }
 0x379   : > { %v3548_v49 = vadd.f32 %v1930_v32, %v4348_v40  ;;  %v1932_v50 = vpop.f32.mrb[5].mxu0  ;;  %v2003_v53 = vpop.f32.mrb[5].mxu1  ;;  %v3550_v58 = vadd.f32 %v2001_v44, %v4353_v48 }
 0x37a   : > { %v3549_v54 = vadd.f32 %v1932_v50, %v4350_v42  ;;  %v3551_v1 = vadd.f32 %v2003_v53, %v4357_v3 }
 0x37b   : > { %v2010_v55 = vmul.f32 0.5, %v3548_v49 }
 0x37c   : > { %v2011_v57 = vmul.f32 0.5, %v3549_v54  ;;  %v2012_v4 = vmul.f32 0.5, %v3551_v1 }
 0x37d   : > { %3698 = vtanh.f32 %v2010_v55 }
 0x37e   : > { %3700 = vtanh.f32 %v2011_v57 }
 0x37f   : > { %3702 = vtanh.f32 %v3550_v58 }
 0x380   : > { %3704 = vtanh.f32 %v2012_v4 }
 0x387   : > { %v3699_v6 = vpop.eup %3698 }
 0x388   : > { %v3701_v7 = vpop.eup %3700  ;;  %v2016_v12 = vadd.f32 1.0, %v3699_v6 }
 0x389   : > { %v2017_v13 = vadd.f32 1.0, %v3701_v7  ;;  %v3703_v19 = vpop.eup %3702 }
 0x38a   : > { %v2019_v14 = vmul.f32 0.5, %v2016_v12  ;;  %v3705_v36 = vpop.eup %3704 }
 0x38b   : > { %v2020_v20 = vmul.f32 0.5, %v2017_v13  ;;  %v2018_v37 = vadd.f32 1.0, %v3705_v36 }
 0x38c   : > { %v2024_v25 = vmul.f32 %v3703_v19, %v2019_v14 }
 0x38d   : > { %v2023_v26 = vmul.f32 %v2020_v20, %v4402_v31  ;;  %v2021_v38 = vmul.f32 0.5, %v2018_v37 }
 0x38f   : > { %v4444_v30 = vadd.f32 %v2024_v25, %v2023_v26 }
 0x391   : > { %3706 = vtanh.f32 %v4444_v30 }
 0x39b   : > { %v3707_v41 = vpop.eup %3706 }
 0x39c   : > { %v2027_v43 = vmul.f32 %v3707_v41, %v2021_v38 }
 0x39e   : > { %2093 = vmatmul.mubr.f32.vlgmr.msra.gmra.mrb[6].mxu0 %v2027_v43  ;;  %2164 = vmatmul.mubr.f32.vlgmr.msra.gmra.mrb[6].mxu1 %v2027_v43 }
 0x39f   : > { %3287 = vmatpush1.bf16.msra.mxu0 %v4210_v60  ;;  %3319 = vmatpush1.bf16.msra.mxu1 %v4214_v61 }
 0x3a0   : > { %3289 = vmatprep.subr.bf16.mxu0 %v4216_v62  ;;  %3321 = vmatprep.subr.bf16.mxu1 %v4220_v2 }
 0x3a1   : > { %2256 = vmatprep.mubr.f32.mxu0 %v3923_v8  ;;  %2327 = vmatprep.mubr.f32.mxu1 %v3923_v8 }
 0x3a3   : > { %3291 = vmatpush1.bf16.msra.mxu0 %v4226_v9  ;;  %3323 = vmatpush1.bf16.msra.mxu1 %v4230_v10 }
 0x3a4   : > { %3293 = vmatprep.subr.bf16.mxu0 %v4232_v11  ;;  %3325 = vmatprep.subr.bf16.mxu1 %v4235_v15 }
 0x3a7   : > { %3295 = vmatpush1.bf16.msra.mxu0 %v4240_v21  ;;  %3327 = vmatpush1.bf16.msra.mxu1 %v4244_v22 }
 0x3a8   : > { %3297 = vmatprep.subr.bf16.mxu0 %v4246_v23  ;;  %3329 = vmatprep.subr.bf16.mxu1 %v4249_v27 }
 0x3ab   : > { %3299 = vmatpush1.bf16.msra.mxu0 %v4252_v33  ;;  %3331 = vmatpush1.bf16.msra.mxu1 %v4256_v34 }
 0x3ac   : > { %3301 = vmatprep.subr.bf16.mxu0 %v4258_v35  ;;  %3333 = vmatprep.subr.bf16.mxu1 %v4261_v39 }
 0x3af   : > { %3303 = vmatpush1.bf16.msra.mxu0 %v4264_v45  ;;  %3335 = vmatpush1.bf16.msra.mxu1 %v4268_v46 }
 0x3b0   : > { %3305 = vmatprep.subr.bf16.mxu0 %v4270_v47  ;;  %3337 = vmatprep.subr.bf16.mxu1 %v4273_v51 }
 0x3b3   : > { %3307 = vmatpush1.bf16.msra.mxu0 %v4276_v59  ;;  %3339 = vmatpush1.bf16.msra.mxu1 %v4280_v63 }
 0x3b4   : > { %3309 = vmatprep.subr.bf16.mxu0 %v4282_v0  ;;  %3341 = vmatprep.subr.bf16.mxu1 %v4285_v5 }
 0x3b7   : > { %3311 = vmatpush1.bf16.msra.mxu0 %v4288_v16  ;;  %3343 = vmatpush1.bf16.msra.mxu1 %v4292_v17 }
 0x3b8   : > { %3313 = vmatprep.subr.bf16.mxu0 %v4294_v18  ;;  %3345 = vmatprep.subr.bf16.mxu1 %v4297_v24 }
 0x3bb   : > { %3315 = vmatpush1.bf16.msra.mxu0 %v4300_v28  ;;  %3347 = vmatpush1.bf16.msra.mxu1 %v4304_v29 }
 0x3bc   : > { %3349 = vmatprep.subr.bf16.mxu0 %v4201_v52  ;;  %3381 = vmatprep.subr.bf16.mxu1 %v4205_v56 }
 0x471   : > { %v2094_v31 = vpop.f32.mrb[6].mxu0  ;;  %v2165_v32 = vpop.f32.mrb[6].mxu1 }
 0x472   : > { %v3552_v44 = vadd.f32 %v2094_v31, %v4348_v40  ;;  %v2096_v49 = vpop.f32.mrb[7].mxu0  ;;  %v2167_v50 = vpop.f32.mrb[7].mxu1  ;;  %v3554_v57 = vadd.f32 %v2165_v32, %v4353_v48 }
 0x473   : > { %v3553_v53 = vadd.f32 %v2096_v49, %v4350_v42  ;;  %v3555_v58 = vadd.f32 %v2167_v50, %v4357_v3 }
 0x474   : > { %v2174_v54 = vmul.f32 0.5, %v3552_v44 }
 0x475   : > { %v2175_v55 = vmul.f32 0.5, %v3553_v53  ;;  %v2176_v1 = vmul.f32 0.5, %v3555_v58 }
 0x476   : > { %3708 = vtanh.f32 %v2174_v54 }
 0x477   : > { %3710 = vtanh.f32 %v2175_v55 }
 0x478   : > { %3712 = vtanh.f32 %v3554_v57 }
 0x479   : > { %3714 = vtanh.f32 %v2176_v1 }
 0x480   : > { %v3709_v4 = vpop.eup %3708 }
 0x481   : > { %v3711_v6 = vpop.eup %3710  ;;  %v2180_v7 = vadd.f32 1.0, %v3709_v4 }
 0x482   : > { %v2181_v12 = vadd.f32 1.0, %v3711_v6  ;;  %v3713_v14 = vpop.eup %3712 }
 0x483   : > { %v2183_v13 = vmul.f32 0.5, %v2180_v7  ;;  %v3715_v36 = vpop.eup %3714 }
 0x484   : > { %v2184_v19 = vmul.f32 0.5, %v2181_v12  ;;  %v2182_v37 = vadd.f32 1.0, %v3715_v36 }
 0x485   : > { %v2188_v20 = vmul.f32 %v3713_v14, %v2183_v13 }
 0x486   : > { %v2187_v25 = vmul.f32 %v2184_v19, %v4444_v30  ;;  %v2185_v38 = vmul.f32 0.5, %v2182_v37 }
 0x488   : > { %v4486_v26 = vadd.f32 %v2188_v20, %v2187_v25 }
 0x48a   : > { %3716 = vtanh.f32 %v4486_v26 }
 0x494   : > { %v3717_v41 = vpop.eup %3716 }
 0x495   : > { %v2191_v43 = vmul.f32 %v3717_v41, %v2185_v38 }
 0x497   : > { %2257 = vmatmul.mubr.f32.vlgmr.msra.gmra.mrb[8].mxu0 %v2191_v43  ;;  %2328 = vmatmul.mubr.f32.vlgmr.msra.gmra.mrb[8].mxu1 %v2191_v43 }
 0x498   : > { %3351 = vmatpush1.bf16.msra.mxu0 %v4210_v60  ;;  %3383 = vmatpush1.bf16.msra.mxu1 %v4214_v61 }
 0x499   : > { %3353 = vmatprep.subr.bf16.mxu0 %v4216_v62  ;;  %3385 = vmatprep.subr.bf16.mxu1 %v4220_v2 }
 0x49a   : > { %2420 = vmatprep.mubr.f32.mxu0 %v3923_v8  ;;  %2491 = vmatprep.mubr.f32.mxu1 %v3923_v8 }
 0x49c   : > { %3355 = vmatpush1.bf16.msra.mxu0 %v4226_v9  ;;  %3387 = vmatpush1.bf16.msra.mxu1 %v4230_v10 }
 0x49d   : > { %3357 = vmatprep.subr.bf16.mxu0 %v4232_v11  ;;  %3389 = vmatprep.subr.bf16.mxu1 %v4235_v15 }
 0x4a0   : > { %3359 = vmatpush1.bf16.msra.mxu0 %v4240_v21  ;;  %3391 = vmatpush1.bf16.msra.mxu1 %v4244_v22 }
 0x4a1   : > { %3361 = vmatprep.subr.bf16.mxu0 %v4246_v23  ;;  %3393 = vmatprep.subr.bf16.mxu1 %v4249_v27 }
 0x4a4   : > { %3363 = vmatpush1.bf16.msra.mxu0 %v4252_v33  ;;  %3395 = vmatpush1.bf16.msra.mxu1 %v4256_v34 }
 0x4a5   : > { %3365 = vmatprep.subr.bf16.mxu0 %v4258_v35  ;;  %3397 = vmatprep.subr.bf16.mxu1 %v4261_v39 }
 0x4a8   : > { %3367 = vmatpush1.bf16.msra.mxu0 %v4264_v45  ;;  %3399 = vmatpush1.bf16.msra.mxu1 %v4268_v46 }
 0x4a9   : > { %3369 = vmatprep.subr.bf16.mxu0 %v4270_v47  ;;  %3401 = vmatprep.subr.bf16.mxu1 %v4273_v51 }
 0x4ac   : > { %3371 = vmatpush1.bf16.msra.mxu0 %v4276_v59  ;;  %3403 = vmatpush1.bf16.msra.mxu1 %v4280_v63 }
 0x4ad   : > { %3373 = vmatprep.subr.bf16.mxu0 %v4282_v0  ;;  %3405 = vmatprep.subr.bf16.mxu1 %v4285_v5 }
 0x4b0   : > { %3375 = vmatpush1.bf16.msra.mxu0 %v4288_v16  ;;  %3407 = vmatpush1.bf16.msra.mxu1 %v4292_v17 }
 0x4b1   : > { %3377 = vmatprep.subr.bf16.mxu0 %v4294_v18  ;;  %3409 = vmatprep.subr.bf16.mxu1 %v4297_v24 }
 0x4b4   : > { %3379 = vmatpush1.bf16.msra.mxu0 %v4300_v28  ;;  %3411 = vmatpush1.bf16.msra.mxu1 %v4304_v29 }
 0x4b5   : > { %3413 = vmatprep.subr.bf16.mxu0 %v4201_v52  ;;  %3445 = vmatprep.subr.bf16.mxu1 %v4205_v56 }
 0x56a   : > { %v2258_v30 = vpop.f32.mrb[8].mxu0  ;;  %v2329_v31 = vpop.f32.mrb[8].mxu1 }
 0x56b   : > { %v3556_v32 = vadd.f32 %v2258_v30, %v4348_v40  ;;  %v2260_v44 = vpop.f32.mrb[9].mxu0  ;;  %v2331_v49 = vpop.f32.mrb[9].mxu1  ;;  %v3558_v55 = vadd.f32 %v2329_v31, %v4353_v48 }
 0x56c   : > { %v3557_v50 = vadd.f32 %v2260_v44, %v4350_v42  ;;  %v3559_v57 = vadd.f32 %v2331_v49, %v4357_v3 }
 0x56d   : > { %v2338_v53 = vmul.f32 0.5, %v3556_v32 }
 0x56e   : > { %v2339_v54 = vmul.f32 0.5, %v3557_v50  ;;  %v2340_v58 = vmul.f32 0.5, %v3559_v57 }
 0x56f   : > { %3718 = vtanh.f32 %v2338_v53 }
 0x570   : > { %3720 = vtanh.f32 %v2339_v54 }
 0x571   : > { %3722 = vtanh.f32 %v3558_v55 }
 0x572   : > { %3724 = vtanh.f32 %v2340_v58 }
 0x579   : > { %v3719_v1 = vpop.eup %3718 }
 0x57a   : > { %v3721_v4 = vpop.eup %3720  ;;  %v2344_v6 = vadd.f32 1.0, %v3719_v1 }
 0x57b   : > { %v2345_v7 = vadd.f32 1.0, %v3721_v4  ;;  %v3723_v13 = vpop.eup %3722 }
 0x57c   : > { %v2347_v12 = vmul.f32 0.5, %v2344_v6  ;;  %v3725_v36 = vpop.eup %3724 }
 0x57d   : > { %v2348_v14 = vmul.f32 0.5, %v2345_v7  ;;  %v2346_v37 = vadd.f32 1.0, %v3725_v36 }
 0x57e   : > { %v2352_v19 = vmul.f32 %v3723_v13, %v2347_v12 }
 0x57f   : > { %v2351_v20 = vmul.f32 %v2348_v14, %v4486_v26  ;;  %v2349_v38 = vmul.f32 0.5, %v2346_v37 }
 0x581   : > { %v4528_v25 = vadd.f32 %v2352_v19, %v2351_v20 }
 0x583   : > { %3726 = vtanh.f32 %v4528_v25 }
 0x58d   : > { %v3727_v41 = vpop.eup %3726 }
 0x58e   : > { %v2355_v43 = vmul.f32 %v3727_v41, %v2349_v38 }
 0x590   : > { %2421 = vmatmul.mubr.f32.vlgmr.msra.gmra.mrb[10].mxu0 %v2355_v43  ;;  %2492 = vmatmul.mubr.f32.vlgmr.msra.gmra.mrb[10].mxu1 %v2355_v43 }
 0x591   : > { %3415 = vmatpush1.bf16.msra.mxu0 %v4210_v60  ;;  %3447 = vmatpush1.bf16.msra.mxu1 %v4214_v61 }
 0x592   : > { %3417 = vmatprep.subr.bf16.mxu0 %v4216_v62  ;;  %3449 = vmatprep.subr.bf16.mxu1 %v4220_v2 }
 0x593   : > { %2584 = vmatprep.mubr.f32.mxu0 %v3923_v8  ;;  %2655 = vmatprep.mubr.f32.mxu1 %v3923_v8 }
 0x595   : > { %3419 = vmatpush1.bf16.msra.mxu0 %v4226_v9  ;;  %3451 = vmatpush1.bf16.msra.mxu1 %v4230_v10 }
 0x596   : > { %3421 = vmatprep.subr.bf16.mxu0 %v4232_v11  ;;  %3453 = vmatprep.subr.bf16.mxu1 %v4235_v15 }
 0x599   : > { %3423 = vmatpush1.bf16.msra.mxu0 %v4240_v21  ;;  %3455 = vmatpush1.bf16.msra.mxu1 %v4244_v22 }
 0x59a   : > { %3425 = vmatprep.subr.bf16.mxu0 %v4246_v23  ;;  %3457 = vmatprep.subr.bf16.mxu1 %v4249_v27 }
 0x59d   : > { %3427 = vmatpush1.bf16.msra.mxu0 %v4252_v33  ;;  %3459 = vmatpush1.bf16.msra.mxu1 %v4256_v34 }
 0x59e   : > { %3429 = vmatprep.subr.bf16.mxu0 %v4258_v35  ;;  %3461 = vmatprep.subr.bf16.mxu1 %v4261_v39 }
 0x5a1   : > { %3431 = vmatpush1.bf16.msra.mxu0 %v4264_v45  ;;  %3463 = vmatpush1.bf16.msra.mxu1 %v4268_v46 }
 0x5a2   : > { %3433 = vmatprep.subr.bf16.mxu0 %v4270_v47  ;;  %3465 = vmatprep.subr.bf16.mxu1 %v4273_v51 }
 0x5a5   : > { %3435 = vmatpush1.bf16.msra.mxu0 %v4276_v59  ;;  %3467 = vmatpush1.bf16.msra.mxu1 %v4280_v63 }
 0x5a6   : > { %3437 = vmatprep.subr.bf16.mxu0 %v4282_v0  ;;  %3469 = vmatprep.subr.bf16.mxu1 %v4285_v5 }
 0x5a9   : > { %3439 = vmatpush1.bf16.msra.mxu0 %v4288_v16  ;;  %3471 = vmatpush1.bf16.msra.mxu1 %v4292_v17 }
 0x5aa   : > { %3441 = vmatprep.subr.bf16.mxu0 %v4294_v18  ;;  %3473 = vmatprep.subr.bf16.mxu1 %v4297_v24 }
 0x5ad   : > { %3443 = vmatpush1.bf16.msra.mxu0 %v4300_v28  ;;  %3475 = vmatpush1.bf16.msra.mxu1 %v4304_v29 }
 0x5ae   : > { %3477 = vmatprep.subr.bf16.mxu0 %v4201_v52  ;;  %3509 = vmatprep.subr.bf16.mxu1 %v4205_v56 }
 0x663   : > { %v2422_v26 = vpop.f32.mrb[10].mxu0  ;;  %v2493_v30 = vpop.f32.mrb[10].mxu1 }
 0x664   : > { %v3560_v31 = vadd.f32 %v2422_v26, %v4348_v40  ;;  %v2424_v32 = vpop.f32.mrb[11].mxu0  ;;  %v2495_v44 = vpop.f32.mrb[11].mxu1  ;;  %v3562_v54 = vadd.f32 %v2493_v30, %v4353_v48 }
 0x665   : > { %v3561_v49 = vadd.f32 %v2424_v32, %v4350_v42  ;;  %v3563_v55 = vadd.f32 %v2495_v44, %v4357_v3 }
 0x666   : > { %v2502_v50 = vmul.f32 0.5, %v3560_v31 }
 0x667   : > { %v2503_v53 = vmul.f32 0.5, %v3561_v49  ;;  %v2504_v52 = vmul.f32 0.5, %v3563_v55 }
 0x668   : > { %3728 = vtanh.f32 %v2502_v50 }
 0x669   : > { %3730 = vtanh.f32 %v2503_v53 }
 0x66a   : > { %3732 = vtanh.f32 %v3562_v54 }
 0x66b   : > { %3734 = vtanh.f32 %v2504_v52 }
 0x672   : > { %v3729_v57 = vpop.eup %3728 }
 0x673   : > { %v3731_v56 = vpop.eup %3730  ;;  %v2508_v58 = vadd.f32 1.0, %v3729_v57 }
 0x674   : > { %v2509_v1 = vadd.f32 1.0, %v3731_v56  ;;  %v3733_v6 = vpop.eup %3732 }
 0x675   : > { %v2511_v4 = vmul.f32 0.5, %v2508_v58  ;;  %v3735_v19 = vpop.eup %3734 }
 0x676   : > { %v2512_v7 = vmul.f32 0.5, %v2509_v1  ;;  %v2510_v20 = vadd.f32 1.0, %v3735_v19 }
 0x677   : > { %v2516_v12 = vmul.f32 %v3733_v6, %v2511_v4 }
 0x678   : > { %v2515_v13 = vmul.f32 %v2512_v7, %v4528_v25  ;;  %v2513_v36 = vmul.f32 0.5, %v2510_v20 }
 0x67a   : > { %v4570_v14 = vadd.f32 %v2516_v12, %v2515_v13 }
 0x67c   : > { %3736 = vtanh.f32 %v4570_v14 }
 0x686   : > { %v3737_v37 = vpop.eup %3736 }
 0x687   : > { %v2519_v38 = vmul.f32 %v3737_v37, %v2513_v36 }
 0x689   : > { %2585 = vmatmul.mubr.f32.vlgmr.msra.gmra.mrb[12].mxu0 %v2519_v38  ;;  %2656 = vmatmul.mubr.f32.vlgmr.msra.gmra.mrb[12].mxu1 %v2519_v38 }
 0x68a   : > { %3479 = vmatpush1.bf16.msra.mxu0 %v4210_v60  ;;  %3511 = vmatpush1.bf16.msra.mxu1 %v4214_v61 }
 0x68b   : > { %3481 = vmatprep.subr.bf16.mxu0 %v4216_v62  ;;  %3513 = vmatprep.subr.bf16.mxu1 %v4220_v2 }
 0x68c   : > { %2748 = vmatprep.mubr.f32.mxu0 %v3923_v8  ;;  %2819 = vmatprep.mubr.f32.mxu1 %v3923_v8 }
 0x68e   : > { %3483 = vmatpush1.bf16.msra.mxu0 %v4226_v9  ;;  %3515 = vmatpush1.bf16.msra.mxu1 %v4230_v10 }
 0x68f   : > { %3485 = vmatprep.subr.bf16.mxu0 %v4232_v11  ;;  %3517 = vmatprep.subr.bf16.mxu1 %v4235_v15 }
 0x692   : > { %3487 = vmatpush1.bf16.msra.mxu0 %v4240_v21  ;;  %3519 = vmatpush1.bf16.msra.mxu1 %v4244_v22 }
 0x693   : > { %3489 = vmatprep.subr.bf16.mxu0 %v4246_v23  ;;  %3521 = vmatprep.subr.bf16.mxu1 %v4249_v27 }
 0x696   : > { %3491 = vmatpush1.bf16.msra.mxu0 %v4252_v33  ;;  %3523 = vmatpush1.bf16.msra.mxu1 %v4256_v34 }
 0x697   : > { %3493 = vmatprep.subr.bf16.mxu0 %v4258_v35  ;;  %3525 = vmatprep.subr.bf16.mxu1 %v4261_v39 }
 0x69a   : > { %3495 = vmatpush1.bf16.msra.mxu0 %v4264_v45  ;;  %3527 = vmatpush1.bf16.msra.mxu1 %v4268_v46 }
 0x69b   : > { %3497 = vmatprep.subr.bf16.mxu0 %v4270_v47  ;;  %3529 = vmatprep.subr.bf16.mxu1 %v4273_v51 }
 0x69e   : > { %3499 = vmatpush1.bf16.msra.mxu0 %v4276_v59  ;;  %3531 = vmatpush1.bf16.msra.mxu1 %v4280_v63 }
 0x69f   : > { %3501 = vmatprep.subr.bf16.mxu0 %v4282_v0  ;;  %3533 = vmatprep.subr.bf16.mxu1 %v4285_v5 }
 0x6a2   : > { %3503 = vmatpush1.bf16.msra.mxu0 %v4288_v16  ;;  %3535 = vmatpush1.bf16.msra.mxu1 %v4292_v17 }
 0x6a3   : > { %3505 = vmatprep.subr.bf16.mxu0 %v4294_v18  ;;  %3537 = vmatprep.subr.bf16.mxu1 %v4297_v24 }
 0x6a6   : > { %3507 = vmatpush1.bf16.msra.mxu0 %v4300_v28  ;;  %3539 = vmatpush1.bf16.msra.mxu1 %v4304_v29 }
 0x75c   : > { %v2586_v8 = vpop.f32.mrb[12].mxu0  ;;  %v2657_v60 = vpop.f32.mrb[12].mxu1 }
 0x75d   : > { %v3564_v61 = vadd.f32 %v2586_v8, %v4348_v40  ;;  %v2588_v62 = vpop.f32.mrb[13].mxu0  ;;  %v2659_v2 = vpop.f32.mrb[13].mxu1  ;;  %v3566_v15 = vadd.f32 %v2657_v60, %v4353_v48 }
 0x75e   : > { %v3565_v9 = vadd.f32 %v2588_v62, %v4350_v42  ;;  %v3567_v21 = vadd.f32 %v2659_v2, %v4357_v3 }
 0x75f   : > { %v2666_v10 = vmul.f32 0.5, %v3564_v61 }
 0x760   : > { %v2667_v11 = vmul.f32 0.5, %v3565_v9  ;;  %v2668_v22 = vmul.f32 0.5, %v3567_v21 }
 0x761   : > { %3738 = vtanh.f32 %v2666_v10 }
 0x762   : > { %3740 = vtanh.f32 %v2667_v11 }
 0x763   : > { %3742 = vtanh.f32 %v3566_v15 }
 0x764   : > { %3744 = vtanh.f32 %v2668_v22 }
 0x76b   : > { %v3739_v23 = vpop.eup %3738 }
 0x76c   : > { %v3741_v27 = vpop.eup %3740  ;;  %v2672_v33 = vadd.f32 1.0, %v3739_v23 }
 0x76d   : > { %v2673_v34 = vadd.f32 1.0, %v3741_v27  ;;  %v3743_v39 = vpop.eup %3742 }
 0x76e   : > { %v2675_v35 = vmul.f32 0.5, %v2672_v33  ;;  %v3745_v59 = vpop.eup %3744 }
 0x76f   : > { %v2676_v45 = vmul.f32 0.5, %v2673_v34  ;;  %v2674_v63 = vadd.f32 1.0, %v3745_v59 }
 0x770   : > { %v2680_v46 = vmul.f32 %v3743_v39, %v2675_v35 }
 0x771   : > { %v2679_v47 = vmul.f32 %v2676_v45, %v4570_v14  ;;  %v2677_v0 = vmul.f32 0.5, %v2674_v63 }
 0x773   : > { %v2681_v51 = vadd.f32 %v2680_v46, %v2679_v47 }
 0x775   : > { %3746 = vtanh.f32 %v2681_v51 }
 0x77f   : > { %v3747_v5 = vpop.eup %3746 }
 0x780   : > { %v2683_v16 = vmul.f32 %v3747_v5, %v2677_v0 }
 0x782   : > { %2749 = vmatmul.mubr.f32.vlgmr.msra.gmra.mrb[14].mxu0 %v2683_v16  ;;  %2820 = vmatmul.mubr.f32.vlgmr.msra.gmra.mrb[14].mxu1 %v2683_v16 }
 0x855   : > { %v2750_v17 = vpop.f32.mrb[14].mxu0  ;;  %v2821_v18 = vpop.f32.mrb[14].mxu1 }
 0x856   : > { %v3568_v24 = vadd.f32 %v2750_v17, %v4348_v40  ;;  %v2752_v28 = vpop.f32.mrb[15].mxu0  ;;  %v2823_v29 = vpop.f32.mrb[15].mxu1  ;;  %v3570_v26 = vadd.f32 %v2821_v18, %v4353_v48 }
 0x857   : > { %v3569_v25 = vadd.f32 %v2752_v28, %v4350_v42  ;;  %v3571_v30 = vadd.f32 %v2823_v29, %v4357_v3 }
 0x858   : > { %v2830_v41 = vmul.f32 0.5, %v3568_v24 }
 0x859   : > { %v2831_v43 = vmul.f32 0.5, %v3569_v25  ;;  %v2832_v31 = vmul.f32 0.5, %v3571_v30 }
 0x85a   : > { %3748 = vtanh.f32 %v2830_v41 }
 0x85b   : > { %3750 = vtanh.f32 %v2831_v43 }
 0x85c   : > { %3752 = vtanh.f32 %v3570_v26 }
 0x85d   : > { %3754 = vtanh.f32 %v2832_v31 }
 0x864   : > { %v3749_v32 = vpop.eup %3748 }
 0x865   : > { %v3751_v44 = vpop.eup %3750  ;;  %v2836_v49 = vadd.f32 1.0, %v3749_v32 }
 0x866   : > { %v2837_v50 = vadd.f32 1.0, %v3751_v44  ;;  %v3753_v53 = vpop.eup %3752 }
 0x867   : > { %v2839_v40 = vmul.f32 0.5, %v2836_v49  ;;  %v3755_v57 = vpop.eup %3754 }
 0x868   : > { %v2840_v54 = vmul.f32 0.5, %v2837_v50  ;;  %v2838_v48 = vadd.f32 1.0, %v3755_v57 }
 0x869   : > { %v2844_v55 = vmul.f32 %v3753_v53, %v2839_v40 }
 0x86a   : > { %v2843_v42 = vmul.f32 %v2840_v54, %v2681_v51  ;;  %v2841_v56 = vmul.f32 0.5, %v2838_v48 }
 0x86c   : > { %v2845_v52 = vadd.f32 %v2844_v55, %v2843_v42 }
 0x86e   : > { %3756 = vtanh.f32 %v2845_v52  ;;  %2849 = vst [vmem:[#allocation3] sm:$0x3] %v2845_v52 }
 0x875   : > { %2853 = sbr.rel (%p2959_p6) target bundleno = 2172 (0x87c), region = 56 }
 0x878   : > { %v3757_v58 = vpop.eup %3756 }
 0x879   : > { %v2847_v1 = vmul.f32 %v3757_v58, %v2841_v56 }
 0x87b   : > { %2848 = vst [vmem:[#allocation2] sm:$0x3] %v2847_v1  ;;  %2854 = vst [vmem:[#allocation10] sm:$0x3] (!%p2959_p6), %v2847_v1 }
 0x87c PF: > { %p3634_p4 = scmp.eq.s32.totalorder %s3969_s19, 1  ;;  %s3924_s5 = smov [#allocation10]  }
 0x87d   : > { %s2862_s8 = sshll.u32 %s3924_s5, 4  ;;  %s2863_s8 = int_to_ptr.vmem [resolvable:$true] %s2862_s8 }
 0x87e   : > { %s3844_s9 = scalar_lea.vmem %s2863_s8, 32  ;;  %p3851_p12 = scmp.lt.s32.totalorder %s2863_s8, %s2863_s8 }
 0x87f   : > { %p3845_p7 = scmp.ne.s32.totalorder %s2863_s8, %s3844_s9  ;;  %p3852_p8 = scmp.lt.s32.totalorder %s3844_s9, %s3844_s9 }
 0x881   : > { %p3846_p11 = pnand %p3845_p7, %p3634_p4  ;;  %p3853_p10 = por %p3852_p8, %p3851_p12 }
 0x883   : > { %p3847_p13 = pneg %p3846_p11 }
 0x885   : > { %p3854_p0 = pnand %p3853_p10, %p3847_p13 }
 0x887   : > { %3857 = shalt.err (!%p3854_p0)
}
 0x888   : > { %s3858_s27 = scalar_lea.hbm %s4655_s4, 32 }
 0x889   : > { %p3859_p5 = scmp.ne.s32.totalorder %s4655_s4, %s3858_s27  ;;  %p3864_p2 = scmp.lt.u32.totalorder %s3858_s27, %s4655_s4 }
 0x88b   : > { %p3860_p9 = pnand %p3859_p5, %p3634_p4 }
 0x88d   : > { %p3861_p1 = pneg %p3860_p9 }
 0x88f   : > { %p3866_p3 = pnand %p3864_p2, %p3861_p1 }
 0x891   : > { %3869 = shalt.err (!%p3866_p3)
}
 0x892   : > { %3615 = dma.vmem_to_hbm [thread:$0]  (%p3634_p4), %s2863_s8, 32, %s4655_s4, [#allocation6]  }
 0x893   : > { %3895 = dma.done.wait (%p3634_p4), [#allocation6], 32  }
 0x894   : > { %3897 = vsyncadd (%p3634_p4), [#allocation6], 4294967264 }
 0x895 PF: > { %p16_p6 = scmp.ge.s32.totalorder %s3972_s20, 4   ;;  %s4671_s15 = smov %s3904_s16 }
 0x896   : > { %s4672_s16 = smov %s3908_s17  ;;  %s4673_s17 = smov %s3982_s23 }
 0x897   : > { %s4674_s18 = smov %s3972_s20  ;;  %18 = sbr.rel (!%p16_p6) target bundleno = 5 (0x5), region = 89 }
 0x89e   :  { %2875 = vsyncpa [#allocation5], 1 }
 0x89f   :  { %2877 = vsyncpa [#allocation5 + $0x1], 1 }
 0x8a0   :  { %2878 = vsyncpa [#allocation8], 1 }
 0x8a1   :  { %2879 = vsyncpa [#allocation6], 1 }
 0x8a2   :  { %2881 = vsyncpa [#allocation6 + $0x1], 1 }

</bundles_post_ra>
